<compile_context>
chip_gen: v7x
topology: tpu7x:2x2x1
jax: 0.10.0
libtpu: 0.0.40
codegen_flags: <defaults>
</compile_context>

<pallas_src>
import functools

import jax
import jax.numpy as jnp
import numpy as np
from jax import lax
from jax.experimental import pallas as pl
from jax.experimental.pallas import tpu as pltpu


# Up to this channel count the channel-half swap runs as a tiny 0/1 matmul on
# the (idle) MXU — per-element cost = C MACs, hidden under HBM time on all
# chips.  Above it the matmul would become the binding unit, so we fall back
# to three static sublane slice-adds.
_PERM_MXU_MAX_C = 128


def _sru_body(x_ref, cpack_ref, oh_lo_ref, oh_hi_ref, perm_ref, o_ref, *,
              L, eps, logit_tau, split):
    x = x_ref[...].astype(jnp.float32)            # (B, C, HW)
    B, C, HW = x.shape

    cpack = cpack_ref[...]                        # (C, 4): [gamma, beta, w_gamma, t]
    w = cpack[:, 0:1][None]                       # (1, C, 1) GroupBatchnorm2d gamma
    b = cpack[:, 1:2][None]                       # (1, C, 1) GroupBatchnorm2d beta
    wg = cpack[:, 2:3][None]                      # (1, C, 1) weight / sum(weight)
    t = cpack[:, 3:4].astype(jnp.int32)           # (C, 1) per-channel group boundary
    oh_lo = oh_lo_ref[...][None]                  # (1, C, G) channel -> low group
    oh_hi = oh_hi_ref[...][None]                  # (1, C, G) channel -> high group

    hw_iota = lax.broadcasted_iota(jnp.int32, (C, HW), 1)
    hi_mask = (hw_iota >= t)[None]                # (1, C, HW)

    # ---- pass 1: per-group means (boundary decomposition, no per-group loop)
    x_lo = jnp.where(hi_mask, 0.0, x)
    row_sum = jnp.sum(x, axis=2, keepdims=True)              # (B, C, 1)
    row_sum_lo = jnp.sum(x_lo, axis=2, keepdims=True)
    row_sum_hi = row_sum - row_sum_lo
    g_sum = jnp.sum(row_sum_lo * oh_lo + row_sum_hi * oh_hi,
                    axis=1, keepdims=True)                    # (B, 1, G)
    mean_g = g_sum * (1.0 / L)
    mean_lo = jnp.sum(oh_lo * mean_g, axis=2, keepdims=True)  # (B, C, 1)
    mean_hi = jnp.sum(oh_hi * mean_g, axis=2, keepdims=True)
    mean_map = jnp.where(hi_mask, mean_hi, mean_lo)           # (B, C, HW)

    # ---- pass 2: centered variance (two-pass; matches torch.std, ddof=1,
    #      no cancellation even when |mean| >> std) --------------------------
    d = x - mean_map
    dsq = d * d
    dsq_lo = jnp.where(hi_mask, 0.0, dsq)
    row_dsq = jnp.sum(dsq, axis=2, keepdims=True)
    row_dsq_lo = jnp.sum(dsq_lo, axis=2, keepdims=True)
    row_dsq_hi = row_dsq - row_dsq_lo
    g_dsq = jnp.sum(row_dsq_lo * oh_lo + row_dsq_hi * oh_hi,
                    axis=1, keepdims=True)                    # (B, 1, G)
    inv_g = 1.0 / (jnp.sqrt(g_dsq * (1.0 / (L - 1))) + eps)   # 1 / (std + eps)

    # fold gamma into the per-channel scale (tiny (B, C, 1) math)
    inv_lo = jnp.sum(oh_lo * inv_g, axis=2, keepdims=True)    # (B, C, 1)
    inv_hi = jnp.sum(oh_hi * inv_g, axis=2, keepdims=True)
    scale_lo = inv_lo * w
    scale_hi = inv_hi * w
    scale_map = jnp.where(hi_mask, scale_hi, scale_lo)
    gn = d * scale_map + b                                    # GroupBatchnorm2d output

    # ---- SRU gating: sigmoid(gn*wg) >= tau  <=>  gn*wg >= logit(tau) -------
    info = (gn * wg) >= logit_tau
    x1 = jnp.where(info, gn, 0.0)
    x2 = gn - x1                                              # noninfo_mask * gn

    # ---- reconstruct: swap the first two channel-halves of x2 --------------
    s = split
    if perm_ref is not None:
        perm_b = perm_ref[...]                                # (B, C, C), 0/1
        x2_sw = jnp.einsum('bcd,bdh->bch', perm_b, x2,
                           preferred_element_type=jnp.float32,
                           precision=jax.lax.Precision.HIGHEST)
        o_ref[...] = (x1 + x2_sw).astype(o_ref.dtype)
    else:
        o_ref[:, 0:s, :] = (x1[:, 0:s, :] + x2[:, s:2 * s, :]).astype(o_ref.dtype)
        o_ref[:, s:2 * s, :] = (x1[:, s:2 * s, :] + x2[:, 0:s, :]).astype(o_ref.dtype)
        o_ref[:, 2 * s:, :] = (x1[:, 2 * s:, :] + x2[:, 2 * s:, :]).astype(o_ref.dtype)


def _tpu_topology():
    """(physical VMEM bytes per core, TensorCores per chip) with safe fallbacks."""
    vmem_cap = 64 * 1024 * 1024          # conservative default (v7x per-core size)
    num_cores = 1
    try:
        info = pltpu.get_tpu_info()
        for name in ("vmem_capacity_bytes", "vmem_bytes", "vmem_size_bytes"):
            val = getattr(info, name, None)
            if val:
                vmem_cap = int(val)
                break
        for name in ("num_tensorcores", "tensorcores_per_chip", "num_cores"):
            val = getattr(info, name, None)
            if val:
                num_cores = int(val)
                break
    except Exception:
        pass
    if num_cores == 1:
        try:
            kind = jax.devices()[0].device_kind.lower()
            if "v7" in kind:             # v7x: 2 TensorCores per chip
                num_cores = 2
        except Exception:
            pass
    return vmem_cap, num_cores


def _choose_batch_block(N, C, HW, vmem_limit, num_cores, use_mxu_swap):
    """Largest batch block (divisor of N) whose estimated footprint fits VMEM.

    Footprint per batch element ~= 14 block-sized buffers (2 double-buffered
    input + 2 output windows + ~10 live full-tile intermediates), padded to
    the (8, 128) vreg tiling, plus the host-broadcast permutation operand.
    On multi-TensorCore chips prefer a grid length divisible by the core
    count (balanced megacore split); on single-core chips one maximal block
    (grid == 1) is best — no ">= 2 steps" constraint.
    """
    cp = -(-C // 8) * 8
    hwp = -(-HW // 128) * 128
    cl = -(-C // 128) * 128
    per_b = 14 * cp * hwp * 4
    if use_mxu_swap:
        per_b += 2 * cp * cl * 4
    budget = max(vmem_limit - (2 << 20), per_b)
    divisors = [d for d in range(1, N + 1) if N % d == 0]
    fitting = [d for d in divisors if d * per_b <= budget]
    if not fitting:
        return 1
    if num_cores > 1:
        balanced = [d for d in fitting if (N // d) % num_cores == 0]
        if balanced:
            return max(balanced)
    return max(fitting)


def sru_forward(x, weight, bias, *, group_num=16, eps=1e-10,
                gate_treshold=0.5, io_dtype=None):
    """SRU forward.  x: (N, C, H, W); weight/bias: (C,) GroupBatchnorm2d params.

    io_dtype selects the HBM storage dtype for x / output (e.g. jnp.bfloat16
    halves HBM traffic in the mem-bound regime on v5e/v6e); all statistics and
    compute stay float32 inside the kernel.  Default keeps the input dtype.
    """
    N, C, H, W = x.shape
    HW = H * W
    G = group_num
    assert C >= G, "GroupBatchnorm2d requires c_num >= group_num"
    assert (C * HW) % G == 0
    # reconstruct() unpacks torch.split(x, C//2, dim=1) into 3 chunks, which
    # the PyTorch module only supports for odd C >= 3.
    assert C % 2 == 1 and C // 2 > 0
    L = (C * HW) // G
    s = C // 2
    if io_dtype is None:
        io_dtype = x.dtype

    # ---- host-side constants (batch independent, DMA'd into VMEM once) -----
    ch = np.arange(C)
    flat0 = ch * HW                                  # flat index of (c, hw=0)
    g_lo = flat0 // L                                # low group id per channel
    g_hi = np.minimum(g_lo + 1, G - 1)               # high group id (clamped)
    t = np.minimum((g_lo + 1) * L - flat0, HW).astype(np.float32)  # boundary col
    oh_lo = np.zeros((C, G), np.float32)
    oh_lo[ch, g_lo] = 1.0
    oh_hi = np.zeros((C, G), np.float32)
    oh_hi[ch, g_hi] = 1.0

    weight = weight.reshape(C).astype(jnp.float32)
    bias = bias.reshape(C).astype(jnp.float32)
    w_gamma = weight / jnp.sum(weight)
    cpack = jnp.stack([weight, bias, w_gamma, jnp.asarray(t)], axis=1)  # (C, 4)

    gate = float(gate_treshold)
    if gate <= 0.0:
        logit_tau = -float("inf")
    elif gate >= 1.0:
        logit_tau = float("inf")
    else:
        # sigmoid(z) >= tau  <=>  z >= log(tau / (1 - tau))  (sigmoid monotone)
        logit_tau = float(np.log(gate / (1.0 - gate)))

    use_mxu_swap = C <= _PERM_MXU_MAX_C

    vmem_cap, num_cores = _tpu_topology()
    vmem_limit = int(vmem_cap * 0.72)       # ~46 MiB on v7x, ~92 MiB on v5e/v6e
    B_blk = _choose_batch_block(N, C, HW, vmem_limit, num_cores, use_mxu_swap)
    grid = (N // B_blk,)

    x2d = x.reshape(N, C, HW).astype(io_dtype)

    kernel_body = functools.partial(_sru_body, L=L, eps=float(eps),
                                    logit_tau=logit_tau, split=s)

    xio_spec = pl.BlockSpec((B_blk, C, HW), lambda n: (n, 0, 0))
    const_c4 = pl.BlockSpec((C, 4), lambda n: (0, 0))
    const_cg = pl.BlockSpec((C, G), lambda n: (0, 0))

    in_specs = [xio_spec, const_c4, const_cg, const_cg]
    operands = [x2d, cpack, jnp.asarray(oh_lo), jnp.asarray(oh_hi)]

    if use_mxu_swap:
        # Channel-half swap as a tiny batched 0/1 matmul on the otherwise idle
        # MXU -> one lane-dense store instead of three sublane-sliced stores.
        # Broadcast on the host to (B_blk, C, C) so nothing is re-materialized
        # per grid step inside the kernel (constant index_map -> loaded once).
        perm = np.zeros((C, C), np.float32)
        perm_idx = np.concatenate(
            [np.arange(s, 2 * s), np.arange(0, s), np.arange(2 * s, C)])
        perm[ch, perm_idx] = 1.0
        perm_b = jnp.broadcast_to(jnp.asarray(perm), (B_blk, C, C))
        in_specs.append(pl.BlockSpec((B_blk, C, C), lambda n: (0, 0, 0)))
        operands.append(perm_b)

        def kernel(x_ref, cpack_ref, ohlo_ref, ohhi_ref, perm_ref, o_ref):
            kernel_body(x_ref, cpack_ref, ohlo_ref, ohhi_ref, perm_ref, o_ref)
    else:
        # TODO(synk): large-C fallback uses three static sublane slice-adds;
        # an XLU-shuffle variant would avoid misaligned stores when C%16 != 1.
        def kernel(x_ref, cpack_ref, ohlo_ref, ohhi_ref, o_ref):
            kernel_body(x_ref, cpack_ref, ohlo_ref, ohhi_ref, None, o_ref)

    out = pl.pallas_call(
        kernel,
        out_shape=jax.ShapeDtypeStruct((N, C, HW), io_dtype),
        grid_spec=pltpu.PrefetchScalarGridSpec(
            num_scalar_prefetch=0,
            grid=grid,
            in_specs=in_specs,
            out_specs=xio_spec,
        ),
        compiler_params=pltpu.CompilerParams(
            dimension_semantics=("parallel",),
            vmem_limit_bytes=vmem_limit,
        ),
    )(*operands)

    return out.reshape(N, C, H, W)


def sru_reference(x, weight, bias, *, group_num=16, eps=1e-10,
                  gate_treshold=0.5):
    """Pure-JAX reference mirroring the PyTorch module semantics."""
    N, C, H, W = x.shape
    weight = weight.reshape(C)
    xg = x.reshape(N, group_num, -1)
    mean = xg.mean(axis=2, keepdims=True)
    std = jnp.sqrt(xg.var(axis=2, ddof=1, keepdims=True))   # torch.std (unbiased)
    xg = (xg - mean) / (std + eps)
    xn = xg.reshape(N, C, H, W)
    gn_x = xn * weight.reshape(1, C, 1, 1) + bias.reshape(1, C, 1, 1)

    w_gamma = (weight / jnp.sum(weight)).reshape(1, C, 1, 1)
    rw = jax.nn.sigmoid(gn_x * w_gamma)
    info = rw >= gate_treshold
    x1 = jnp.where(info, gn_x, 0.0)
    x2 = jnp.where(info, 0.0, gn_x)

    s = C // 2
    x11, x12, x13 = x1[:, :s], x1[:, s:2 * s], x1[:, 2 * s:]
    x21, x22, x23 = x2[:, :s], x2[:, s:2 * s], x2[:, 2 * s:]
    return jnp.concatenate([x11 + x22, x12 + x21, x13 + x23], axis=1)


if __name__ == "__main__":
    key = jax.random.PRNGKey(0)
    k_x, k_w = jax.random.split(key)

    # C must be odd (reconstruct unpacks 3 split chunks) and >= group_num.
    N, C, H, W = 4, 17, 16, 16
    group_num = 16

    # Non-zero mean / non-unit scale exercises the two-pass variance path.
    x = 1.5 * jax.random.normal(k_x, (N, C, H, W), dtype=jnp.float32) + 3.0
    # GroupBatchnorm2d.__init__: weight ~ randn(C,1,1), bias = zeros(C,1,1)
    weight = jax.random.normal(k_w, (C,), dtype=jnp.float32)
    bias = jnp.zeros((C,), dtype=jnp.float32)

    out = sru_forward(x, weight, bias, group_num=group_num)
    out = jax.block_until_ready(out)

    ref = sru_reference(x, weight, bias, group_num=group_num)
    np.testing.assert_allclose(np.asarray(out), np.asarray(ref),
                               rtol=1e-4, atol=1e-4)

    print("KERNEL_OK")
</pallas_src>

<mosaic_0001>
module attributes {stable_mosaic.version = 11 : i64} {
  func.func @kernel(%arg0: i32, %arg1: memref<4x17x256xf32, #tpu.memory_space<vmem>>, %arg2: memref<17x4xf32, #tpu.memory_space<vmem>>, %arg3: memref<17x16xf32, #tpu.memory_space<vmem>>, %arg4: memref<17x16xf32, #tpu.memory_space<vmem>>, %arg5: memref<4x17x17xf32, #tpu.memory_space<vmem>>, %arg6: memref<4x17x256xf32, #tpu.memory_space<vmem>>) attributes {dimension_semantics = [#tpu.dimension_semantics<parallel>], iteration_bounds = array<i64: 1>, scalar_prefetch = 0 : i64, scratch_operands = 0 : i64, tpu.core_type = #tpu.core_type<tc>, window_params = [{transform_indices = @transform_0, window_bounds = array<i64: 4, 17, 256>}, {pipeline_mode = #tpu.pipeline_mode<synchronous>, transform_indices = @transform_1, window_bounds = array<i64: 17, 4>}, {pipeline_mode = #tpu.pipeline_mode<synchronous>, transform_indices = @transform_2, window_bounds = array<i64: 17, 16>}, {pipeline_mode = #tpu.pipeline_mode<synchronous>, transform_indices = @transform_3, window_bounds = array<i64: 17, 16>}, {pipeline_mode = #tpu.pipeline_mode<synchronous>, transform_indices = @transform_4, window_bounds = array<i64: 4, 17, 17>}, {transform_indices = @transform_5, window_bounds = array<i64: 4, 17, 256>}]} {
    %c0 = arith.constant 0 : index
    %c0_0 = arith.constant 0 : index
    %c0_1 = arith.constant 0 : index
    %0 = vector.load %arg1[%c0, %c0_0, %c0_1] : memref<4x17x256xf32, #tpu.memory_space<vmem>>, vector<4x17x256xf32>
    %c0_2 = arith.constant 0 : index
    %c0_3 = arith.constant 0 : index
    %1 = vector.load %arg2[%c0_2, %c0_3] : memref<17x4xf32, #tpu.memory_space<vmem>>, vector<17x4xf32>
    %2 = vector.extract_strided_slice %1 {offsets = [0, 0], sizes = [17, 1], strides = [1, 1]} : vector<17x4xf32> to vector<17x1xf32>
    %3 = vector.shape_cast %2 : vector<17x1xf32> to vector<1x17x1xf32>
    %4 = vector.extract_strided_slice %1 {offsets = [0, 1], sizes = [17, 1], strides = [1, 1]} : vector<17x4xf32> to vector<17x1xf32>
    %5 = vector.shape_cast %4 : vector<17x1xf32> to vector<1x17x1xf32>
    %6 = vector.extract_strided_slice %1 {offsets = [0, 2], sizes = [17, 1], strides = [1, 1]} : vector<17x4xf32> to vector<17x1xf32>
    %7 = vector.shape_cast %6 : vector<17x1xf32> to vector<1x17x1xf32>
    %8 = vector.extract_strided_slice %1 {offsets = [0, 3], sizes = [17, 1], strides = [1, 1]} : vector<17x4xf32> to vector<17x1xf32>
    %9 = arith.fptosi %8 : vector<17x1xf32> to vector<17x1xi32>
    %c0_4 = arith.constant 0 : index
    %c0_5 = arith.constant 0 : index
    %10 = vector.load %arg3[%c0_4, %c0_5] : memref<17x16xf32, #tpu.memory_space<vmem>>, vector<17x16xf32>
    %11 = vector.shape_cast %10 : vector<17x16xf32> to vector<1x17x16xf32>
    %c0_6 = arith.constant 0 : index
    %c0_7 = arith.constant 0 : index
    %12 = vector.load %arg4[%c0_6, %c0_7] : memref<17x16xf32, #tpu.memory_space<vmem>>, vector<17x16xf32>
    %13 = vector.shape_cast %12 : vector<17x16xf32> to vector<1x17x16xf32>
    %14 = tpu.iota {dimensions = array<i32: 1>} : vector<17x256xi32>
    %15 = vector.broadcast %9 : vector<17x1xi32> to vector<17x256xi32>
    %16 = arith.cmpi sge, %14, %15 : vector<17x256xi32>
    %17 = vector.shape_cast %16 : vector<17x256xi1> to vector<1x17x256xi1>
    %cst = arith.constant 0.000000e+00 : f32
    %18 = vector.shape_cast %17 : vector<1x17x256xi1> to vector<1x17x256xi1>
    %19 = vector.broadcast %18 : vector<1x17x256xi1> to vector<4x17x256xi1>
    %20 = vector.broadcast %cst : f32 to vector<4x17x256xf32>
    %21 = arith.select %19, %20, %0 : vector<4x17x256xi1>, vector<4x17x256xf32>
    %cst_8 = arith.constant dense<0.000000e+00> : vector<4x17xf32>
    %22 = vector.multi_reduction <add>, %0, %cst_8 [2] : vector<4x17x256xf32> to vector<4x17xf32>
    %23 = vector.shape_cast %22 : vector<4x17xf32> to vector<4x17x1xf32>
    %cst_9 = arith.constant dense<0.000000e+00> : vector<4x17xf32>
    %24 = vector.multi_reduction <add>, %21, %cst_9 [2] : vector<4x17x256xf32> to vector<4x17xf32>
    %25 = vector.shape_cast %24 : vector<4x17xf32> to vector<4x17x1xf32>
    %26 = arith.subf %23, %25 : vector<4x17x1xf32>
    %27 = vector.broadcast %25 : vector<4x17x1xf32> to vector<4x17x16xf32>
    %28 = vector.broadcast %11 : vector<1x17x16xf32> to vector<4x17x16xf32>
    %29 = arith.mulf %27, %28 : vector<4x17x16xf32>
    %30 = vector.broadcast %26 : vector<4x17x1xf32> to vector<4x17x16xf32>
    %31 = vector.broadcast %13 : vector<1x17x16xf32> to vector<4x17x16xf32>
    %32 = arith.mulf %30, %31 : vector<4x17x16xf32>
    %33 = arith.addf %29, %32 : vector<4x17x16xf32>
    %cst_10 = arith.constant dense<0.000000e+00> : vector<4x16xf32>
    %34 = vector.multi_reduction <add>, %33, %cst_10 [1] : vector<4x17x16xf32> to vector<4x16xf32>
    %35 = vector.shape_cast %34 : vector<4x16xf32> to vector<4x1x16xf32>
    %cst_11 = arith.constant 0.0036764706 : f32
    %36 = vector.broadcast %cst_11 : f32 to vector<4x1x16xf32>
    %37 = arith.mulf %35, %36 : vector<4x1x16xf32>
    %38 = vector.broadcast %11 : vector<1x17x16xf32> to vector<4x17x16xf32>
    %39 = vector.broadcast %37 : vector<4x1x16xf32> to vector<4x17x16xf32>
    %40 = arith.mulf %38, %39 : vector<4x17x16xf32>
    %cst_12 = arith.constant dense<0.000000e+00> : vector<4x17xf32>
    %41 = vector.multi_reduction <add>, %40, %cst_12 [2] : vector<4x17x16xf32> to vector<4x17xf32>
    %42 = vector.shape_cast %41 : vector<4x17xf32> to vector<4x17x1xf32>
    %43 = vector.broadcast %13 : vector<1x17x16xf32> to vector<4x17x16xf32>
    %44 = vector.broadcast %37 : vector<4x1x16xf32> to vector<4x17x16xf32>
    %45 = arith.mulf %43, %44 : vector<4x17x16xf32>
    %cst_13 = arith.constant dense<0.000000e+00> : vector<4x17xf32>
    %46 = vector.multi_reduction <add>, %45, %cst_13 [2] : vector<4x17x16xf32> to vector<4x17xf32>
    %47 = vector.shape_cast %46 : vector<4x17xf32> to vector<4x17x1xf32>
    %48 = vector.shape_cast %17 : vector<1x17x256xi1> to vector<1x17x256xi1>
    %49 = vector.broadcast %48 : vector<1x17x256xi1> to vector<4x17x256xi1>
    %50 = vector.shape_cast %47 : vector<4x17x1xf32> to vector<4x17x1xf32>
    %51 = vector.broadcast %50 : vector<4x17x1xf32> to vector<4x17x256xf32>
    %52 = vector.shape_cast %42 : vector<4x17x1xf32> to vector<4x17x1xf32>
    %53 = vector.broadcast %52 : vector<4x17x1xf32> to vector<4x17x256xf32>
    %54 = arith.select %49, %51, %53 : vector<4x17x256xi1>, vector<4x17x256xf32>
    %55 = arith.subf %0, %54 : vector<4x17x256xf32>
    %56 = arith.mulf %55, %55 : vector<4x17x256xf32>
    %cst_14 = arith.constant 0.000000e+00 : f32
    %57 = vector.shape_cast %17 : vector<1x17x256xi1> to vector<1x17x256xi1>
    %58 = vector.broadcast %57 : vector<1x17x256xi1> to vector<4x17x256xi1>
    %59 = vector.broadcast %cst_14 : f32 to vector<4x17x256xf32>
    %60 = arith.select %58, %59, %56 : vector<4x17x256xi1>, vector<4x17x256xf32>
    %cst_15 = arith.constant dense<0.000000e+00> : vector<4x17xf32>
    %61 = vector.multi_reduction <add>, %56, %cst_15 [2] : vector<4x17x256xf32> to vector<4x17xf32>
    %62 = vector.shape_cast %61 : vector<4x17xf32> to vector<4x17x1xf32>
    %cst_16 = arith.constant dense<0.000000e+00> : vector<4x17xf32>
    %63 = vector.multi_reduction <add>, %60, %cst_16 [2] : vector<4x17x256xf32> to vector<4x17xf32>
    %64 = vector.shape_cast %63 : vector<4x17xf32> to vector<4x17x1xf32>
    %65 = arith.subf %62, %64 : vector<4x17x1xf32>
    %66 = vector.broadcast %64 : vector<4x17x1xf32> to vector<4x17x16xf32>
    %67 = vector.broadcast %11 : vector<1x17x16xf32> to vector<4x17x16xf32>
    %68 = arith.mulf %66, %67 : vector<4x17x16xf32>
    %69 = vector.broadcast %65 : vector<4x17x1xf32> to vector<4x17x16xf32>
    %70 = vector.broadcast %13 : vector<1x17x16xf32> to vector<4x17x16xf32>
    %71 = arith.mulf %69, %70 : vector<4x17x16xf32>
    %72 = arith.addf %68, %71 : vector<4x17x16xf32>
    %cst_17 = arith.constant dense<0.000000e+00> : vector<4x16xf32>
    %73 = vector.multi_reduction <add>, %72, %cst_17 [1] : vector<4x17x16xf32> to vector<4x16xf32>
    %74 = vector.shape_cast %73 : vector<4x16xf32> to vector<4x1x16xf32>
    %cst_18 = arith.constant 0.00369003695 : f32
    %75 = vector.broadcast %cst_18 : f32 to vector<4x1x16xf32>
    %76 = arith.mulf %74, %75 : vector<4x1x16xf32>
    %77 = math.sqrt %76 : vector<4x1x16xf32>
    %cst_19 = arith.constant 1.000000e-10 : f32
    %78 = vector.broadcast %cst_19 : f32 to vector<4x1x16xf32>
    %79 = arith.addf %77, %78 : vector<4x1x16xf32>
    %cst_20 = arith.constant 1.000000e+00 : f32
    %80 = vector.broadcast %cst_20 : f32 to vector<4x1x16xf32>
    %81 = arith.divf %80, %79 : vector<4x1x16xf32>
    %82 = vector.broadcast %11 : vector<1x17x16xf32> to vector<4x17x16xf32>
    %83 = vector.broadcast %81 : vector<4x1x16xf32> to vector<4x17x16xf32>
    %84 = arith.mulf %82, %83 : vector<4x17x16xf32>
    %cst_21 = arith.constant dense<0.000000e+00> : vector<4x17xf32>
    %85 = vector.multi_reduction <add>, %84, %cst_21 [2] : vector<4x17x16xf32> to vector<4x17xf32>
    %86 = vector.shape_cast %85 : vector<4x17xf32> to vector<4x17x1xf32>
    %87 = vector.broadcast %13 : vector<1x17x16xf32> to vector<4x17x16xf32>
    %88 = vector.broadcast %81 : vector<4x1x16xf32> to vector<4x17x16xf32>
    %89 = arith.mulf %87, %88 : vector<4x17x16xf32>
    %cst_22 = arith.constant dense<0.000000e+00> : vector<4x17xf32>
    %90 = vector.multi_reduction <add>, %89, %cst_22 [2] : vector<4x17x16xf32> to vector<4x17xf32>
    %91 = vector.shape_cast %90 : vector<4x17xf32> to vector<4x17x1xf32>
    %92 = vector.broadcast %3 : vector<1x17x1xf32> to vector<4x17x1xf32>
    %93 = arith.mulf %86, %92 : vector<4x17x1xf32>
    %94 = vector.broadcast %3 : vector<1x17x1xf32> to vector<4x17x1xf32>
    %95 = arith.mulf %91, %94 : vector<4x17x1xf32>
    %96 = vector.shape_cast %17 : vector<1x17x256xi1> to vector<1x17x256xi1>
    %97 = vector.broadcast %96 : vector<1x17x256xi1> to vector<4x17x256xi1>
    %98 = vector.shape_cast %95 : vector<4x17x1xf32> to vector<4x17x1xf32>
    %99 = vector.broadcast %98 : vector<4x17x1xf32> to vector<4x17x256xf32>
    %100 = vector.shape_cast %93 : vector<4x17x1xf32> to vector<4x17x1xf32>
    %101 = vector.broadcast %100 : vector<4x17x1xf32> to vector<4x17x256xf32>
    %102 = arith.select %97, %99, %101 : vector<4x17x256xi1>, vector<4x17x256xf32>
    %103 = arith.mulf %55, %102 : vector<4x17x256xf32>
    %104 = vector.broadcast %5 : vector<1x17x1xf32> to vector<4x17x256xf32>
    %105 = arith.addf %103, %104 : vector<4x17x256xf32>
    %106 = vector.broadcast %7 : vector<1x17x1xf32> to vector<4x17x256xf32>
    %107 = arith.mulf %105, %106 : vector<4x17x256xf32>
    %cst_23 = arith.constant 0.000000e+00 : f32
    %108 = vector.broadcast %cst_23 : f32 to vector<4x17x256xf32>
    %109 = arith.cmpf oge, %107, %108 : vector<4x17x256xf32>
    %cst_24 = arith.constant 0.000000e+00 : f32
    %110 = vector.broadcast %cst_24 : f32 to vector<4x17x256xf32>
    %111 = arith.select %109, %105, %110 : vector<4x17x256xi1>, vector<4x17x256xf32>
    %112 = arith.subf %105, %111 : vector<4x17x256xf32>
    %c0_25 = arith.constant 0 : index
    %c0_26 = arith.constant 0 : index
    %c0_27 = arith.constant 0 : index
    %113 = vector.load %arg5[%c0_25, %c0_26, %c0_27] : memref<4x17x17xf32, #tpu.memory_space<vmem>>, vector<4x17x17xf32>
    "tpu.trace_start"() <{level = 10 : i32, message = "bcd,bdh->bch"}> : () -> ()
    %cst_28 = arith.constant dense<0.000000e+00> : vector<4x17x256xf32>
    %114 = tpu.matmul %113, %112, %cst_28 {dimension_numbers = #tpu.dot_dimension_numbers<[2], [1], [1], [2], [0, 0, 0, 1, 1, 2], [0], [0]>, precision = #tpu.contract_precision<fp32>} : vector<4x17x17xf32>, vector<4x17x256xf32>, vector<4x17x256xf32> -> vector<4x17x256xf32>
    "tpu.trace_stop"() : () -> ()
    %115 = arith.addf %111, %114 : vector<4x17x256xf32>
    %c0_29 = arith.constant 0 : index
    %c0_30 = arith.constant 0 : index
    %c0_31 = arith.constant 0 : index
    %116 = vector.load %arg6[%c0_29, %c0_30, %c0_31] : memref<4x17x256xf32, #tpu.memory_space<vmem>>, vector<4x17x256xf32>
    tpu.vector_store %arg6[%c0_29, %c0_30, %c0_31], %115 {strides = array<i32>} : memref<4x17x256xf32, #tpu.memory_space<vmem>>, vector<4x17x256xf32>,
    return
  }
  func.func @transform_0(%arg0: i32) -> (i32, i32, i32) {
    %c0_i32 = arith.constant 0 : i32
    %c0_i32_0 = arith.constant 0 : i32
    %c0_i32_1 = arith.constant 0 : i32
    return %arg0, %c0_i32, %c0_i32_0 : i32, i32, i32
  }
  func.func @transform_1(%arg0: i32) -> (i32, i32) {
    %c0_i32 = arith.constant 0 : i32
    %c0_i32_0 = arith.constant 0 : i32
    %c0_i32_1 = arith.constant 0 : i32
    return %c0_i32, %c0_i32_0 : i32, i32
  }
  func.func @transform_2(%arg0: i32) -> (i32, i32) {
    %c0_i32 = arith.constant 0 : i32
    %c0_i32_0 = arith.constant 0 : i32
    %c0_i32_1 = arith.constant 0 : i32
    return %c0_i32, %c0_i32_0 : i32, i32
  }
  func.func @transform_3(%arg0: i32) -> (i32, i32) {
    %c0_i32 = arith.constant 0 : i32
    %c0_i32_0 = arith.constant 0 : i32
    %c0_i32_1 = arith.constant 0 : i32
    return %c0_i32, %c0_i32_0 : i32, i32
  }
  func.func @transform_4(%arg0: i32) -> (i32, i32, i32) {
    %c0_i32 = arith.constant 0 : i32
    %c0_i32_0 = arith.constant 0 : i32
    %c0_i32_1 = arith.constant 0 : i32
    %c0_i32_2 = arith.constant 0 : i32
    return %c0_i32, %c0_i32_0, %c0_i32_1 : i32, i32, i32
  }
  func.func @transform_5(%arg0: i32) -> (i32, i32, i32) {
    %c0_i32 = arith.constant 0 : i32
    %c0_i32_0 = arith.constant 0 : i32
    %c0_i32_1 = arith.constant 0 : i32
    return %arg0, %c0_i32, %c0_i32_0 : i32, i32, i32
  }
}

</mosaic_0001>

<bundles_post_ra>
// kernel: tpu_custom_call.1
= control target key start
LH: loop header
LB: loop body
LE: loop exit
PB: predicated region body
PF: predicated region fallthrough
CT: control target
= control target key end

     0   :  { %v3997_v0 = vmov 3   ;;  %vm116_vm0 = vcmask 1040384   ;;  %v56_v32 = vlaneseq  ;;  %v5992_v37 = vmov 0  ;;  %s5916_s1 = inlined_call_operand.vmem [shape: f32[17,4], index: 1, kind: input, shape index: {}]   ;;  %s5917_s0 = inlined_call_operand.vmem [shape: f32[4,17,256], index: 0, kind: input, shape index: {}]   ;;  %s5918_s3 = inlined_call_operand.vmem [shape: f32[17,16], index: 3, kind: input, shape index: {}]   ;;  %s5919_s2 = inlined_call_operand.vmem [shape: f32[17,16], index: 2, kind: input, shape index: {}]   ;;  %s5920_s4 = inlined_call_operand.vmem [shape: f32[4,17,17], index: 4, kind: input, shape index: {}]   ;;  %s5921_s5 = inlined_call_operand.vmem [shape: f32[4,17,256], index: 5, kind: output, shape index: {}]  }
   0x1   :  { %3960 = vset.pattern.permute.xlu0 %v3997_v0  ;;  %v44_v1 = vld [vmem:[%s5916_s1] sm:$0xff]  ;;  %v45_v2 = vld [vmem:[%s5916_s1 + $0x8] sm:$0xff]  ;;  %3961 = vset.pattern.permute.xlu1 %v3997_v0  ;;  %v46_v3 = vld [vmem:[%s5916_s1 + $0x10] sm:$0x1]  ;;  %v6001_v49 = vmov 0  ;;  %vm247_vm7 = vcmask 130048  }
   0x2   :  { %v3949_v4 = vtrunc.f32 %v44_v1  ;;  %v3951_v5 = vtrunc.f32 %v45_v2  ;;  %v3953_v6 = vtrunc.f32 %v46_v3  ;;  %v4044_v10 = vld [vmem:[%s5917_s0 + $0x10] sm:$0xff]  ;;  %v4049_v11 = vld [vmem:[%s5917_s0 + $0x18] sm:$0xff]  ;;  %v4054_v12 = vld [vmem:[%s5917_s0] sm:$0xff]  ;;  %v57_v33 = vand.u32 127, %v56_v32 }
   0x3   :  { %v4059_v13 = vld [vmem:[%s5917_s0 + $0x8] sm:$0xff]  ;;  %v113_v14 = vadd.f32 %v4049_v11, %v4044_v10  ;;  %v4066_v15 = vld [vmem:[%s5917_s0 + $0x30] sm:$0xff]  ;;  %v4071_v16 = vld [vmem:[%s5917_s0 + $0x38] sm:$0xff]  ;;  %vm251_vm8 = vcmask 122880  }
   0x4   :  { %v3950_v7 = vcvt.f32.s32 %v3949_v4  ;;  %v3954_v8 = vcvt.f32.s32 %v3953_v6  ;;  %v3952_v9 = vcvt.f32.s32 %v3951_v5  ;;  %v110_v17 = vadd.f32 %v4059_v13, %v4054_v12  ;;  %v4078_v18 = vld [vmem:[%s5917_s0 + $0x20] sm:$0x1]  ;;  %v4083_v19 = vld [vmem:[%s5917_s0 + $0x28] sm:$0x1]  ;;  %v4098_v22 = vld [vmem:[%s5917_s0 + $0x50] sm:$0x1] }
   0x5   :  { %v4088_v20 = vld [vmem:[%s5917_s0 + $0x40] sm:$0xff]  ;;  %v4093_v21 = vld [vmem:[%s5917_s0 + $0x48] sm:$0xff]  ;;  %v4103_v23 = vld [vmem:[%s5917_s0 + $0x58] sm:$0x1]  ;;  %v122_v24 = vadd.f32 %v4071_v16, %v4066_v15  ;;  %v117_v25 = vsel %vm116_vm0, %v4078_v18, 0.0  ;;  %v118_v26 = vsel %vm116_vm0, %v4083_v19, 0.0 }
   0x6   :  { %60 = vperm.xlu0 %3960, %v3950_v7   ;;  %66 = vperm.xlu1 %3961, %v3954_v8   ;;  %v125_v27 = vadd.f32 %v4093_v21, %v4088_v20  ;;  %v128_v28 = vsel %vm116_vm0, %v4098_v22, 0.0  ;;  %v129_v29 = vsel %vm116_vm0, %v4103_v23, 0.0  ;;  %v119_v30 = vadd.f32 %v118_v26, %v117_v25  ;;  %v4184_v1 = vld [vmem:[%s5917_s0 + $0x60] sm:$0xff]  ;;  %v4189_v2 = vld [vmem:[%s5917_s0 + $0x68] sm:$0xff]  ;;  %v4196_v5 = vld [vmem:[%s5917_s0 + $0x90] sm:$0xff] }
   0x7   :  { %v130_v31 = vadd.f32 %v129_v29, %v128_v28  ;;  %v58_v34 = vadd.s32 128, %v57_v33  ;;  %v133_v3 = vadd.f32 %v4189_v2, %v4184_v1  ;;  %v4201_v6 = vld [vmem:[%s5917_s0 + $0x70] sm:$0xff]  ;;  %v4206_v7 = vld [vmem:[%s5917_s0 + $0x78] sm:$0xff] }
   0x8   :  { %v4211_v8 = vld [vmem:[%s5917_s0 + $0x98] sm:$0xff] }
   0xa   :  { %63 = vperm.xlu0 %3960, %v3952_v9   ;;  %v136_v9 = vadd.f32 %v4206_v7, %v4201_v6 }
  0x29   :  { %114 = vadd.xlane.f32.xlu0 %v113_v14  ;;  %v144_v14 = vadd.f32 %v4211_v8, %v4196_v5 }
  0x2a   :  { %111 = vadd.xlane.f32.xlu1 %v110_v17  ;;  %v4220_v17 = vld [vmem:[%s5917_s0 + $0xa0] sm:$0xff] }
  0x2d   :  { %123 = vadd.xlane.f32.xlu0 %v122_v24  ;;  %v4225_v24 = vld [vmem:[%s5917_s0 + $0xa8] sm:$0xff] }
  0x2e   :  { %126 = vadd.xlane.f32.xlu1 %v125_v27  ;;  %v147_v27 = vadd.f32 %v4225_v24, %v4220_v17 }
  0x31   :  { %120 = vadd.xlane.f32.xlu0 %v119_v30 }
  0x32   :  { %131 = vadd.xlane.f32.xlu1 %v130_v31 }
  0x85   :  { %v61_v35 = vpop.permute.xlu0 %60  ;;  %v67_v36 = vpop.permute.xlu1 %66 }
  0x86   :  { %vm4117_vm1 = vcmp.ge.s32.totalorder %v57_v33, %v61_v35  ;;  %vm4121_vm2 = vcmp.ge.s32.totalorder %v58_v34, %v61_v35  ;;  %vm4125_vm3 = vcmp.ge.s32.totalorder %v57_v33, %v67_v36  ;;  %vm4129_vm4 = vcmp.ge.s32.totalorder %v58_v34, %v67_v36 }
  0x87   :  { %v5993_v37 = vsel %vm4117_vm1, 4294967295, %v5992_v37  ;;  %v86_v41 = vsel %vm4117_vm1, 0.0, %v4054_v12  ;;  %v87_v42 = vsel %vm4121_vm2, 0.0, %v4059_v13  ;;  %v90_v44 = vsel %vm4125_vm3, 0.0, %v4078_v18 }
  0x88   :  { %5994 = vst [vmem:[#allocation2_spill] sm:$0xff] %v5993_v37  ;;  %v155_v43 = vadd.f32 %v87_v42, %v86_v41  ;;  %v91_v45 = vsel %vm4129_vm4, 0.0, %v4083_v19  ;;  %v92_v47 = vsel %vm4117_vm1, 0.0, %v4066_v15  ;;  %v93_v48 = vsel %vm4121_vm2, 0.0, %v4071_v16 }
  0x89   :  { %v64_v46 = vpop.permute.xlu0 %63  ;;  %v161_v53 = vsel %vm116_vm0, %v90_v44, 0.0  ;;  %v162_v54 = vsel %vm116_vm0, %v91_v45, 0.0  ;;  %v166_v56 = vadd.f32 %v93_v48, %v92_v47  ;;  %v96_v60 = vsel %vm4125_vm3, 0.0, %v4098_v22  ;;  %v4275_v47 = vld [vmem:[%s5917_s0 + $0xb8] sm:$0x1] }
  0x8a   :  { %vm4151_vm5 = vcmp.ge.s32.totalorder %v57_v33, %v64_v46  ;;  %vm4155_vm6 = vcmp.ge.s32.totalorder %v58_v34, %v64_v46  ;;  %156 = vadd.xlane.f32.xlu0 %v155_v43  ;;  %v163_v59 = vadd.f32 %v162_v54, %v161_v53  ;;  %v97_v61 = vsel %vm4129_vm4, 0.0, %v4103_v23  ;;  %v4250_v33 = vld [vmem:[%s5917_s0 + $0x80] sm:$0x1]  ;;  %v4255_v34 = vld [vmem:[%s5917_s0 + $0x88] sm:$0x1] }
  0x8b   :  { %v6002_v49 = vsel %vm4151_vm5, 4294967295, %v6001_v49  ;;  %v88_v51 = vsel %vm4151_vm5, 0.0, %v4044_v10  ;;  %v89_v52 = vsel %vm4155_vm6, 0.0, %v4049_v11  ;;  %v94_v57 = vsel %vm4151_vm5, 0.0, %v4088_v20  ;;  %v4270_v46 = vld [vmem:[%s5917_s0 + $0xb0] sm:$0x1] }
  0x8c   :  { %6003 = vst [vmem:[#allocation3_spill] sm:$0xff] %v6002_v49  ;;  %v158_v55 = vadd.f32 %v89_v52, %v88_v51  ;;  %v95_v58 = vsel %vm4155_vm6, 0.0, %v4093_v21  ;;  %v172_v63 = vsel %vm116_vm0, %v96_v60, 0.0  ;;  %v173_v0 = vsel %vm116_vm0, %v97_v61, 0.0 }
  0x8d   :  { %v169_v62 = vadd.f32 %v95_v58, %v94_v57  ;;  %v174_v4 = vadd.f32 %v173_v0, %v172_v63  ;;  %v98_v25 = vsel %vm4117_vm1, 0.0, %v4184_v1  ;;  %v99_v26 = vsel %vm4121_vm2, 0.0, %v4189_v2 }
  0x8e   :  { %159 = vadd.xlane.f32.xlu1 %v158_v55  ;;  %167 = vadd.xlane.f32.xlu0 %v166_v56  ;;  %v177_v28 = vadd.f32 %v99_v26, %v98_v25  ;;  %v100_v29 = vsel %vm4151_vm5, 0.0, %v4201_v6  ;;  %v101_v30 = vsel %vm4155_vm6, 0.0, %v4206_v7  ;;  %v104_v31 = vsel %vm4117_vm1, 0.0, %v4196_v5 }
  0x8f   :  { %v105_v32 = vsel %vm4121_vm2, 0.0, %v4211_v8  ;;  %v139_v35 = vsel %vm116_vm0, %v4250_v33, 0.0  ;;  %v140_v36 = vsel %vm116_vm0, %v4255_v34, 0.0  ;;  %v180_v41 = vadd.f32 %v101_v30, %v100_v29  ;;  %v4305_v29 = vld [vmem:[%s5919_s2 + $0x8] sm:$0xff] }
  0x90   :  { %v188_v42 = vadd.f32 %v105_v32, %v104_v31  ;;  %v106_v43 = vsel %vm4151_vm5, 0.0, %v4220_v17  ;;  %v107_v44 = vsel %vm4155_vm6, 0.0, %v4225_v24  ;;  %v141_v45 = vadd.f32 %v140_v36, %v139_v35  ;;  %v4310_v30 = vld [vmem:[%s5918_s3 + $0x8] sm:$0xff]  ;;  %v4315_v35 = vld [vmem:[%s5919_s2] sm:$0xff] }
  0x91   :  { %v102_v48 = vsel %vm4125_vm3, 0.0, %v4250_v33  ;;  %v103_v51 = vsel %vm4129_vm4, 0.0, %v4255_v34  ;;  %v150_v52 = vsel %vm116_vm0, %v4270_v46, 0.0  ;;  %v151_v53 = vsel %vm116_vm0, %v4275_v47, 0.0 }
  0x92   :  { %170 = vadd.xlane.f32.xlu1 %v169_v62  ;;  %164 = vadd.xlane.f32.xlu0 %v163_v59  ;;  %v191_v54 = vadd.f32 %v107_v44, %v106_v43  ;;  %v183_v55 = vsel %vm116_vm0, %v102_v48, 0.0  ;;  %v184_v56 = vsel %vm116_vm0, %v103_v51, 0.0  ;;  %v152_v57 = vadd.f32 %v151_v53, %v150_v52 }
  0x93   :  { %v108_v58 = vsel %vm4125_vm3, 0.0, %v4270_v46  ;;  %v109_v59 = vsel %vm4129_vm4, 0.0, %v4275_v47  ;;  %v185_v60 = vadd.f32 %v184_v56, %v183_v55  ;;  %v4325_v55 = vld [vmem:[%s5919_s2 + $0x10] sm:$0x1] }
  0x94   :  { %v194_v61 = vsel %vm116_vm0, %v108_v58, 0.0  ;;  %v195_v62 = vsel %vm116_vm0, %v109_v59, 0.0  ;;  %v4330_v56 = vld [vmem:[%s5918_s3 + $0x10] sm:$0x1] }
  0x95   :  { %v196_v63 = vadd.f32 %v195_v62, %v194_v61 }
  0x96   :  { %175 = vadd.xlane.f32.xlu1 %v174_v4  ;;  %134 = vadd.xlane.f32.xlu0 %v133_v3 }
  0x9a   :  { %137 = vadd.xlane.f32.xlu1 %v136_v9  ;;  %145 = vadd.xlane.f32.xlu0 %v144_v14 }
  0x9e   :  { %148 = vadd.xlane.f32.xlu1 %v147_v27  ;;  %178 = vadd.xlane.f32.xlu0 %v177_v28  ;;  %v4300_v28 = vld [vmem:[%s5918_s3] sm:$0xff] }
  0xa2   :  { %181 = vadd.xlane.f32.xlu1 %v180_v41  ;;  %189 = vadd.xlane.f32.xlu0 %v188_v42 }
  0xa6   :  { %192 = vadd.xlane.f32.xlu1 %v191_v54  ;;  %142 = vadd.xlane.f32.xlu0 %v141_v45 }
  0xaa   :  { %153 = vadd.xlane.f32.xlu1 %v152_v57  ;;  %186 = vadd.xlane.f32.xlu0 %v185_v60 }
  0xae   :  { %197 = vadd.xlane.f32.xlu1 %v196_v63 }
  0xb6   :  { %v115_v0 = vpop.xlane.xlu0 %114 }
  0xb7   :  { %v112_v3 = vpop.xlane.xlu1 %111 }
  0xba   :  { %v124_v4 = vpop.xlane.xlu0 %123 }
  0xbb   :  { %v127_v9 = vpop.xlane.xlu1 %126 }
  0xbe   :  { %v121_v14 = vpop.xlane.xlu0 %120 }
  0xbf   :  { %v132_v25 = vpop.xlane.xlu1 %131 }
 0x117   :  { %v157_v26 = vpop.xlane.xlu0 %156 }
 0x118   :  { %v199_v27 = vsub.f32 %v112_v3, %v157_v26  ;;  %v211_v45 = vmul.f32 %v157_v26, %v4315_v35 }
 0x11a   :  { %v223_v42 = vmul.f32 %v199_v27, %v4300_v28 }
 0x11b   :  { %v160_v31 = vpop.xlane.xlu1 %159  ;;  %v168_v32 = vpop.xlane.xlu0 %167 }
 0x11c   :  { %v200_v36 = vsub.f32 %v115_v0, %v160_v31  ;;  %v202_v41 = vsub.f32 %v124_v4, %v168_v32  ;;  %v212_v43 = vmul.f32 %v160_v31, %v4305_v29  ;;  %v235_v57 = vadd.f32 %v223_v42, %v211_v45 }
 0x11d   :  { %v214_v59 = vmul.f32 %v168_v32, %v4315_v35 }
 0x11e   :  { %v224_v44 = vmul.f32 %v200_v36, %v4310_v30  ;;  %v226_v53 = vmul.f32 %v202_v41, %v4300_v28 }
 0x11f   :  { %v171_v48 = vpop.xlane.xlu1 %170  ;;  %v165_v51 = vpop.xlane.xlu0 %164 }
 0x120   :  { %v236_v52 = vadd.f32 %v224_v44, %v212_v43  ;;  %v203_v54 = vsub.f32 %v127_v9, %v171_v48  ;;  %v201_v58 = vsub.f32 %v121_v14, %v165_v51  ;;  %v215_v60 = vmul.f32 %v171_v48, %v4305_v29 }
 0x121   :  { %v213_v63 = vmul.f32 %v165_v51, %v4325_v55  ;;  %v238_v9 = vadd.f32 %v226_v53, %v214_v59  ;;  %v248_v14 = vsel %vm247_vm7, %v235_v57, 0.0 }
 0x122   :  { %v227_v61 = vmul.f32 %v203_v54, %v4310_v30  ;;  %v249_v62 = vsel %vm247_vm7, %v236_v52, 0.0  ;;  %v225_v0 = vmul.f32 %v201_v58, %v4330_v56 }
 0x123   :  { %v176_v3 = vpop.xlane.xlu1 %175  ;;  %v135_v4 = vpop.xlane.xlu0 %134  ;;  %v250_v32 = vadd.f32 %v249_v62, %v248_v14  ;;  %v260_v48 = vsel %vm247_vm7, %v238_v9, 0.0 }
 0x124   :  { %v239_v26 = vadd.f32 %v227_v61, %v215_v60  ;;  %v204_v27 = vsub.f32 %v132_v25, %v176_v3  ;;  %v237_v31 = vadd.f32 %v225_v0, %v213_v63  ;;  %v216_v41 = vmul.f32 %v176_v3, %v4325_v55 }
 0x126   :  { %v261_v36 = vsel %vm247_vm7, %v239_v26, 0.0  ;;  %v228_v42 = vmul.f32 %v204_v27, %v4330_v56  ;;  %v252_v43 = vsel %vm251_vm8, %v237_v31, 0.0 }
 0x127   :  { %v138_v44 = vpop.xlane.xlu1 %137  ;;  %v146_v45 = vpop.xlane.xlu0 %145  ;;  %v253_v51 = vadd.f32 %v252_v43, %v250_v32  ;;  %v262_v53 = vadd.f32 %v261_v36, %v260_v48 }
 0x128   :  { %v240_v52 = vadd.f32 %v228_v42, %v216_v41 }
 0x129   :  { %v254_v25 = vrot.slane %v253_v51, 4 }
 0x12a   :  { %v263_v54 = vsel %vm251_vm8, %v240_v52, 0.0 }
 0x12b   :  { %v264_v57 = vadd.f32 %v263_v54, %v262_v53  ;;  %v149_v58 = vpop.xlane.xlu1 %148  ;;  %v179_v59 = vpop.xlane.xlu0 %178  ;;  %v255_v60 = vadd.f32 %v254_v25, %v253_v51 }
 0x12c   :  { %v205_v0 = vsub.f32 %v135_v4, %v179_v59  ;;  %v217_v4 = vmul.f32 %v179_v59, %v4315_v35 }
 0x12d   :  { %v265_v61 = vrot.slane %v264_v57, 4  ;;  %v256_v62 = vrot.slane %v255_v60, 2 }
 0x12e   :  { %v229_v41 = vmul.f32 %v205_v0, %v4300_v28 }
 0x12f   :  { %v266_v63 = vadd.f32 %v265_v61, %v264_v57  ;;  %v182_v3 = vpop.xlane.xlu1 %181  ;;  %v190_v26 = vpop.xlane.xlu0 %189  ;;  %v257_v27 = vadd.f32 %v256_v62, %v255_v60 }
 0x130   :  { %v206_v14 = vsub.f32 %v138_v44, %v182_v3  ;;  %v218_v42 = vmul.f32 %v182_v3, %v4305_v29  ;;  %v208_v52 = vsub.f32 %v146_v45, %v190_v26  ;;  %v241_v61 = vadd.f32 %v229_v41, %v217_v4 }
 0x131   :  { %v267_v31 = vrot.slane %v266_v63, 2  ;;  %v258_v9 = vrot.slane %v257_v27, 1 }
 0x132   :  { %v230_v32 = vmul.f32 %v206_v14, %v4310_v30  ;;  %v232_v0 = vmul.f32 %v208_v52, %v4300_v28 }
 0x133   :  { %v268_v36 = vadd.f32 %v267_v31, %v266_v63  ;;  %v193_v43 = vpop.xlane.xlu1 %192  ;;  %v143_v48 = vpop.xlane.xlu0 %142  ;;  %v259_v51 = vadd.f32 %v258_v9, %v257_v27  ;;  %v220_v27 = vmul.f32 %v190_v26, %v4315_v35  ;;  %v271_v26 = vsel %vm247_vm7, %v241_v61, 0.0 }
 0x134   :  { %v209_v53 = vsub.f32 %v149_v58, %v193_v43  ;;  %v242_v54 = vadd.f32 %v230_v32, %v218_v42  ;;  %v221_v3 = vmul.f32 %v193_v43, %v4305_v29 }
 0x135   :  { %v269_v25 = vrot.slane %v268_v36, 1  ;;  %v4349_v57 = vmul.f32 0.0036764706, %v259_v51  ;;  %v244_v52 = vadd.f32 %v232_v0, %v220_v27 }
 0x136   :  { %v233_v44 = vmul.f32 %v209_v53, %v4310_v30  ;;  %v272_v59 = vsel %vm247_vm7, %v242_v54, 0.0 }
 0x137   :  { %v270_v60 = vadd.f32 %v269_v25, %v268_v36  ;;  %v154_v62 = vpop.xlane.xlu1 %153  ;;  %v187_v63 = vpop.xlane.xlu0 %186  ;;  %v298_v45 = vmul.f32 %v4349_v57, %v4305_v29  ;;  %v297_v31 = vmul.f32 %v4349_v57, %v4315_v35  ;;  %v273_v4 = vadd.f32 %v272_v59, %v271_v26 }
 0x138   :  { %v207_v14 = vsub.f32 %v143_v48, %v187_v63  ;;  %v245_v9 = vadd.f32 %v233_v44, %v221_v3  ;;  %v219_v32 = vmul.f32 %v187_v63, %v4325_v55 }
 0x139   :  { %v294_v58 = vmul.f32 0.0036764706, %v270_v60  ;;  %v312_v41 = vsel %vm247_vm7, %v298_v45, 0.0  ;;  %v309_v42 = vsel %vm247_vm7, %v297_v31, 0.0  ;;  %v346_v60 = vmul.f32 %v4349_v57, %v4310_v30 }
 0x13a   :  { %v231_v36 = vmul.f32 %v207_v14, %v4330_v56  ;;  %313 = vadd.xlane.f32.xlu1 %v312_v41  ;;  %310 = vadd.xlane.f32.xlu0 %v309_v42  ;;  %v283_v63 = vsel %vm247_vm7, %v245_v9, 0.0  ;;  %v282_v45 = vsel %vm247_vm7, %v244_v52, 0.0 }
 0x13b   :  { %v198_v43 = vpop.xlane.xlu1 %197  ;;  %v301_v48 = vmul.f32 %v294_v58, %v4305_v29  ;;  %v300_v51 = vmul.f32 %v294_v58, %v4315_v35  ;;  %v284_v27 = vadd.f32 %v283_v63, %v282_v45  ;;  %v360_v9 = vsel %vm247_vm7, %v346_v60, 0.0 }
 0x13c   :  { %v243_v53 = vadd.f32 %v231_v36, %v219_v32  ;;  %v210_v25 = vsub.f32 %v154_v62, %v198_v43  ;;  %v222_v14 = vmul.f32 %v198_v43, %v4325_v55  ;;  %v345_v62 = vmul.f32 %v4349_v57, %v4300_v28 }
 0x13d   :  { %v321_v54 = vsel %vm247_vm7, %v301_v48, 0.0  ;;  %v318_v44 = vsel %vm247_vm7, %v300_v51, 0.0  ;;  %v349_v36 = vmul.f32 %v294_v58, %v4310_v30  ;;  %v348_v48 = vmul.f32 %v294_v58, %v4300_v28 }
 0x13e   :  { %v274_v3 = vsel %vm251_vm8, %v243_v53, 0.0  ;;  %v234_v61 = vmul.f32 %v210_v25, %v4330_v56  ;;  %322 = vadd.xlane.f32.xlu1 %v321_v54  ;;  %319 = vadd.xlane.f32.xlu0 %v318_v44  ;;  %v357_v43 = vsel %vm247_vm7, %v345_v62, 0.0  ;;  %v302_v53 = vmul.f32 %v294_v58, %v4325_v55 }
 0x13f   :  { %v275_v0 = vadd.f32 %v274_v3, %v273_v4  ;;  %v369_v52 = vsel %vm247_vm7, %v349_v36, 0.0  ;;  %v366_v54 = vsel %vm247_vm7, %v348_v48, 0.0  ;;  %v299_v44 = vmul.f32 %v4349_v57, %v4325_v55 }
 0x140   :  { %v246_v59 = vadd.f32 %v234_v61, %v222_v14  ;;  %v324_v3 = vsel %vm251_vm8, %v302_v53, 0.0  ;;  %v350_v14 = vmul.f32 %v294_v58, %v4330_v56  ;;  %v347_v45 = vmul.f32 %v4349_v57, %v4330_v56 }
 0x141   :  { %v276_v31 = vrot.slane %v275_v0, 4  ;;  %v315_v62 = vsel %vm251_vm8, %v299_v44, 0.0 }
 0x142   :  { %v285_v32 = vsel %vm251_vm8, %v246_v59, 0.0  ;;  %361 = vadd.xlane.f32.xlu1 %v360_v9  ;;  %358 = vadd.xlane.f32.xlu0 %v357_v43  ;;  %v363_v9 = vsel %vm251_vm8, %v347_v45, 0.0 }
 0x143   :  { %v277_v41 = vadd.f32 %v276_v31, %v275_v0  ;;  %v286_v42 = vadd.f32 %v285_v32, %v284_v27  ;;  %v372_v31 = vsel %vm251_vm8, %v350_v14, 0.0 }
 0x145   :  { %v278_v51 = vrot.slane %v277_v41, 2  ;;  %v287_v26 = vrot.slane %v286_v42, 4 }
 0x146   :  { %370 = vadd.xlane.f32.xlu1 %v369_v52  ;;  %367 = vadd.xlane.f32.xlu0 %v366_v54 }
 0x147   :  { %v279_v25 = vadd.f32 %v278_v51, %v277_v41  ;;  %v288_v4 = vadd.f32 %v287_v26, %v286_v42 }
 0x149   :  { %v280_v60 = vrot.slane %v279_v25, 1  ;;  %v289_v63 = vrot.slane %v288_v4, 2 }
 0x14a   :  { %325 = vadd.xlane.f32.xlu1 %v324_v3  ;;  %316 = vadd.xlane.f32.xlu0 %v315_v62 }
 0x14b   :  { %v281_v61 = vadd.f32 %v280_v60, %v279_v25  ;;  %v290_v0 = vadd.f32 %v289_v63, %v288_v4 }
 0x14d   :  { %v295_v59 = vmul.f32 0.0036764706, %v281_v61  ;;  %v291_v27 = vrot.slane %v290_v0, 1 }
 0x14e   :  { %373 = vadd.xlane.f32.xlu1 %v372_v31  ;;  %364 = vadd.xlane.f32.xlu0 %v363_v9 }
 0x14f   :  { %v292_v32 = vadd.f32 %v291_v27, %v290_v0  ;;  %v304_v36 = vmul.f32 %v295_v59, %v4305_v29  ;;  %v303_v58 = vmul.f32 %v295_v59, %v4315_v35  ;;  %v352_v52 = vmul.f32 %v295_v59, %v4310_v30 }
 0x150   :  { %v351_v53 = vmul.f32 %v295_v59, %v4300_v28  ;;  %v305_v14 = vmul.f32 %v295_v59, %v4325_v55  ;;  %v353_v45 = vmul.f32 %v295_v59, %v4330_v56 }
 0x151   :  { %v296_v41 = vmul.f32 0.0036764706, %v292_v32  ;;  %v330_v42 = vsel %vm247_vm7, %v304_v36, 0.0  ;;  %v327_v43 = vsel %vm247_vm7, %v303_v58, 0.0  ;;  %v378_v25 = vsel %vm247_vm7, %v352_v52, 0.0 }
 0x152   :  { %331 = vadd.xlane.f32.xlu1 %v330_v42  ;;  %328 = vadd.xlane.f32.xlu0 %v327_v43  ;;  %v375_v54 = vsel %vm247_vm7, %v351_v53, 0.0  ;;  %v333_v62 = vsel %vm251_vm8, %v305_v14, 0.0  ;;  %v381_v31 = vsel %vm251_vm8, %v353_v45, 0.0 }
 0x153   :  { %v307_v57 = vmul.f32 %v296_v41, %v4305_v29  ;;  %v306_v48 = vmul.f32 %v296_v41, %v4315_v35  ;;  %v355_v4 = vmul.f32 %v296_v41, %v4310_v30  ;;  %v354_v44 = vmul.f32 %v296_v41, %v4300_v28 }
 0x154   :  { %v308_v63 = vmul.f32 %v296_v41, %v4325_v55  ;;  %v356_v0 = vmul.f32 %v296_v41, %v4330_v56 }
 0x155   :  { %v339_v51 = vsel %vm247_vm7, %v307_v57, 0.0  ;;  %v336_v26 = vsel %vm247_vm7, %v306_v48, 0.0  ;;  %v387_v60 = vsel %vm247_vm7, %v355_v4, 0.0  ;;  %v384_v3 = vsel %vm247_vm7, %v354_v44, 0.0 }
 0x156   :  { %340 = vadd.xlane.f32.xlu1 %v339_v51  ;;  %337 = vadd.xlane.f32.xlu0 %v336_v26  ;;  %v342_v61 = vsel %vm251_vm8, %v308_v63, 0.0  ;;  %v390_v27 = vsel %vm251_vm8, %v356_v0, 0.0 }
 0x15a   :  { %379 = vadd.xlane.f32.xlu1 %v378_v25  ;;  %376 = vadd.xlane.f32.xlu0 %v375_v54 }
 0x15e   :  { %388 = vadd.xlane.f32.xlu1 %v387_v60  ;;  %385 = vadd.xlane.f32.xlu0 %v384_v3 }
 0x162   :  { %343 = vadd.xlane.f32.xlu1 %v342_v61  ;;  %334 = vadd.xlane.f32.xlu0 %v333_v62 }
 0x166   :  { %391 = vadd.xlane.f32.xlu1 %v390_v27  ;;  %382 = vadd.xlane.f32.xlu0 %v381_v31 }
 0x1c7   :  { %v314_v32 = vpop.xlane.xlu1 %313  ;;  %v311_v9 = vpop.xlane.xlu0 %310 }
 0x1cb   :  { %v323_v36 = vpop.xlane.xlu1 %322  ;;  %v320_v58 = vpop.xlane.xlu0 %319 }
 0x1cf   :  { %v362_v42 = vpop.xlane.xlu1 %361  ;;  %v359_v57 = vpop.xlane.xlu0 %358 }
 0x1d0   :  { %v395_v41 = vsel %vm4151_vm5, %v362_v42, %v314_v32  ;;  %v396_v43 = vsel %vm4155_vm6, %v362_v42, %v314_v32  ;;  %v393_v51 = vsel %vm4117_vm1, %v359_v57, %v311_v9  ;;  %v394_v26 = vsel %vm4121_vm2, %v359_v57, %v311_v9 }
 0x1d1   :  { %v4424_v59 = vsub.f32 %v4044_v10, %v395_v41  ;;  %v4427_v48 = vsub.f32 %v4049_v11, %v396_v43  ;;  %v4434_v52 = vsub.f32 %v4054_v12, %v393_v51  ;;  %v4437_v53 = vsub.f32 %v4059_v13, %v394_v26 }
 0x1d3   :  { %v371_v25 = vpop.xlane.xlu1 %370  ;;  %v443_v10 = vmul.f32 %v4424_v59, %v4424_v59  ;;  %v444_v11 = vmul.f32 %v4427_v48, %v4427_v48  ;;  %v368_v44 = vpop.xlane.xlu0 %367  ;;  %v441_v12 = vmul.f32 %v4434_v52, %v4434_v52  ;;  %v442_v13 = vmul.f32 %v4437_v53, %v4437_v53 }
 0x1d4   :  { %v401_v4 = vsel %vm4151_vm5, %v371_v25, %v323_v36  ;;  %v402_v54 = vsel %vm4155_vm6, %v371_v25, %v323_v36  ;;  %v399_v3 = vsel %vm4117_vm1, %v368_v44, %v320_v58  ;;  %v400_v14 = vsel %vm4121_vm2, %v368_v44, %v320_v58 }
 0x1d5   :  { %v4452_v60 = vsub.f32 %v4088_v20, %v401_v4  ;;  %v4455_v63 = vsub.f32 %v4093_v21, %v402_v54  ;;  %v4462_v61 = vsub.f32 %v4066_v15, %v399_v3  ;;  %v4465_v0 = vsub.f32 %v4071_v16, %v400_v14 }
 0x1d6   :  { %v492_v62 = vadd.f32 %v444_v11, %v443_v10  ;;  %v489_v45 = vadd.f32 %v442_v13, %v441_v12  ;;  %v467_v9 = vsel %vm4151_vm5, 0.0, %v443_v10  ;;  %v468_v36 = vsel %vm4155_vm6, 0.0, %v444_v11 }
 0x1d7   :  { %v326_v27 = vpop.xlane.xlu1 %325  ;;  %v449_v20 = vmul.f32 %v4452_v60, %v4452_v60  ;;  %v450_v21 = vmul.f32 %v4455_v63, %v4455_v63  ;;  %v317_v31 = vpop.xlane.xlu0 %316  ;;  %v447_v32 = vmul.f32 %v4462_v61, %v4462_v61  ;;  %v448_v15 = vmul.f32 %v4465_v0, %v4465_v0 }
 0x1d8   :  { %493 = vadd.xlane.f32.xlu1 %v492_v62  ;;  %490 = vadd.xlane.f32.xlu0 %v489_v45  ;;  %v465_v41 = vsel %vm4117_vm1, 0.0, %v441_v12  ;;  %v466_v43 = vsel %vm4121_vm2, 0.0, %v442_v13  ;;  %v536_v25 = vadd.f32 %v468_v36, %v467_v9 }
 0x1d9   :  { %v503_v16 = vadd.f32 %v450_v21, %v449_v20  ;;  %v500_v58 = vadd.f32 %v448_v15, %v447_v32  ;;  %v473_v10 = vsel %vm4151_vm5, 0.0, %v449_v20  ;;  %v533_v3 = vadd.f32 %v466_v43, %v465_v41 }
 0x1da   :  { %v472_v62 = vsel %vm4121_vm2, 0.0, %v448_v15 }
 0x1db   :  { %v374_v42 = vpop.xlane.xlu1 %373  ;;  %v365_v26 = vpop.xlane.xlu0 %364 }
 0x1dc   :  { %v403_v57 = vsel %vm4125_vm3, %v374_v42, %v326_v27  ;;  %v404_v51 = vsel %vm4129_vm4, %v374_v42, %v326_v27  ;;  %504 = vadd.xlane.f32.xlu1 %v503_v16  ;;  %501 = vadd.xlane.f32.xlu0 %v500_v58  ;;  %v397_v54 = vsel %vm4125_vm3, %v365_v26, %v317_v31 }
 0x1dd   :  { %v4490_v11 = vsub.f32 %v4098_v22, %v403_v57  ;;  %v4493_v4 = vsub.f32 %v4103_v23, %v404_v51  ;;  %v398_v44 = vsel %vm4129_vm4, %v365_v26, %v317_v31  ;;  %v4500_v12 = vsub.f32 %v4078_v18, %v397_v54 }
 0x1de   :  { %v4503_v13 = vsub.f32 %v4083_v19, %v398_v44  ;;  %v474_v22 = vsel %vm4155_vm6, 0.0, %v450_v21  ;;  %v471_v23 = vsel %vm4117_vm1, 0.0, %v447_v32 }
 0x1df   :  { %v332_v14 = vpop.xlane.xlu1 %331  ;;  %v451_v45 = vmul.f32 %v4490_v11, %v4490_v11  ;;  %v452_v18 = vmul.f32 %v4493_v4, %v4493_v4  ;;  %v329_v19 = vpop.xlane.xlu0 %328  ;;  %v445_v27 = vmul.f32 %v4500_v12, %v4500_v12  ;;  %v547_v21 = vadd.f32 %v474_v22, %v473_v10 }
 0x1e0   :  { %537 = vadd.xlane.f32.xlu1 %v536_v25  ;;  %534 = vadd.xlane.f32.xlu0 %v533_v3  ;;  %v446_v20 = vmul.f32 %v4503_v13, %v4503_v13  ;;  %v544_v31 = vadd.f32 %v472_v62, %v471_v23 }
 0x1e1   :  { %v506_v15 = vsel %vm116_vm0, %v451_v45, 0.0  ;;  %v507_v16 = vsel %vm116_vm0, %v452_v18, 0.0  ;;  %v495_v9 = vsel %vm116_vm0, %v445_v27, 0.0  ;;  %v475_v42 = vsel %vm4125_vm3, 0.0, %v451_v45 }
 0x1e2   :  { %v496_v36 = vsel %vm116_vm0, %v446_v20, 0.0  ;;  %v476_v41 = vsel %vm4129_vm4, 0.0, %v452_v18  ;;  %v469_v43 = vsel %vm4125_vm3, 0.0, %v445_v27  ;;  %v470_v57 = vsel %vm4129_vm4, 0.0, %v446_v20 }
 0x1e3   :  { %v341_v32 = vpop.xlane.xlu1 %340  ;;  %v338_v58 = vpop.xlane.xlu0 %337  ;;  %v508_v51 = vadd.f32 %v507_v16, %v506_v15  ;;  %v497_v26 = vadd.f32 %v496_v36, %v495_v9  ;;  %v550_v10 = vsel %vm116_vm0, %v475_v42, 0.0  ;;  %v551_v54 = vsel %vm116_vm0, %v476_v41, 0.0 }
 0x1e4   :  { %548 = vadd.xlane.f32.xlu1 %v547_v21  ;;  %545 = vadd.xlane.f32.xlu0 %v544_v31  ;;  %v539_v44 = vsel %vm116_vm0, %v469_v43, 0.0  ;;  %v540_v3 = vsel %vm116_vm0, %v470_v57, 0.0 }
 0x1e5   :  { %v541_v15 = vadd.f32 %v540_v3, %v539_v44 }
 0x1e7   :  { %v380_v25 = vpop.xlane.xlu1 %379  ;;  %v377_v62 = vpop.xlane.xlu0 %376 }
 0x1e8   :  { %509 = vadd.xlane.f32.xlu1 %v508_v51  ;;  %v407_v22 = vsel %vm4151_vm5, %v380_v25, %v332_v14  ;;  %v408_v23 = vsel %vm4155_vm6, %v380_v25, %v332_v14  ;;  %498 = vadd.xlane.f32.xlu0 %v497_v26  ;;  %v405_v27 = vsel %vm4117_vm1, %v377_v62, %v329_v19 }
 0x1e9   :  { %v4540_v45 = vsub.f32 %v4201_v6, %v407_v22  ;;  %v4543_v18 = vsub.f32 %v4206_v7, %v408_v23  ;;  %v406_v20 = vsel %vm4121_vm2, %v377_v62, %v329_v19  ;;  %v4550_v21 = vsub.f32 %v4184_v1, %v405_v27 }
 0x1ea   :  { %v4553_v31 = vsub.f32 %v4189_v2, %v406_v20  ;;  %v552_v14 = vadd.f32 %v551_v54, %v550_v10 }
 0x1eb   :  { %6006 = vst [vmem:[#allocation4_spill] sm:$0xff] %v4540_v45  ;;  %6007 = vst [vmem:[#allocation5_spill] sm:$0xff] %v4543_v18  ;;  %v389_v16 = vpop.xlane.xlu1 %388  ;;  %v455_v6 = vmul.f32 %v4540_v45, %v4540_v45  ;;  %v456_v7 = vmul.f32 %v4543_v18, %v4543_v18  ;;  %v386_v19 = vpop.xlane.xlu0 %385  ;;  %v453_v2 = vmul.f32 %v4550_v21, %v4550_v21 }
 0x1ec   :  { %6008 = vst [vmem:[#allocation6_spill] sm:$0xff] %v4550_v21  ;;  %6009 = vst [vmem:[#allocation7_spill] sm:$0xff] %v4553_v31  ;;  %553 = vadd.xlane.f32.xlu1 %v552_v14  ;;  %v413_v9 = vsel %vm4151_vm5, %v389_v16, %v341_v32  ;;  %v414_v1 = vsel %vm4155_vm6, %v389_v16, %v341_v32  ;;  %542 = vadd.xlane.f32.xlu0 %v541_v15 }
 0x1ed   :  { %v4566_v36 = vsub.f32 %v4220_v17, %v413_v9  ;;  %v4569_v42 = vsub.f32 %v4225_v24, %v414_v1  ;;  %v411_v41 = vsel %vm4117_vm1, %v386_v19, %v338_v58  ;;  %v412_v43 = vsel %vm4121_vm2, %v386_v19, %v338_v58 }
 0x1ee   :  { %v4576_v57 = vsub.f32 %v4196_v5, %v411_v41  ;;  %v4579_v32 = vsub.f32 %v4211_v8, %v412_v43  ;;  %v514_v51 = vadd.f32 %v456_v7, %v455_v6  ;;  %v454_v17 = vmul.f32 %v4553_v31, %v4553_v31 }
 0x1ef   :  { %6010 = vst [vmem:[#allocation8_spill] sm:$0xff] %v4566_v36  ;;  %6011 = vst [vmem:[#allocation9_spill] sm:$0xff] %v4569_v42  ;;  %v344_v26 = vpop.xlane.xlu1 %343  ;;  %v461_v24 = vmul.f32 %v4566_v36, %v4566_v36  ;;  %v462_v25 = vmul.f32 %v4569_v42, %v4569_v42  ;;  %v335_v58 = vpop.xlane.xlu0 %334  ;;  %v479_v22 = vsel %vm4151_vm5, 0.0, %v455_v6  ;;  %v480_v23 = vsel %vm4155_vm6, 0.0, %v456_v7 }
 0x1f0   :  { %6012 = vst [vmem:[#allocation10_spill] sm:$0xff] %v4576_v57  ;;  %6013 = vst [vmem:[#allocation11_spill] sm:$0xff] %v4579_v32  ;;  %515 = vadd.xlane.f32.xlu1 %v514_v51  ;;  %v511_v10 = vadd.f32 %v454_v17, %v453_v2  ;;  %v459_v5 = vmul.f32 %v4576_v57, %v4576_v57  ;;  %v460_v8 = vmul.f32 %v4579_v32, %v4579_v32 }
 0x1f1   :  { %v525_v54 = vadd.f32 %v462_v25, %v461_v24  ;;  %v477_v14 = vsel %vm4117_vm1, 0.0, %v453_v2  ;;  %v478_v15 = vsel %vm4121_vm2, 0.0, %v454_v17  ;;  %v558_v2 = vadd.f32 %v480_v23, %v479_v22 }
 0x1f2   :  { %512 = vadd.xlane.f32.xlu0 %v511_v10  ;;  %v522_v44 = vadd.f32 %v460_v8, %v459_v5  ;;  %v555_v51 = vadd.f32 %v478_v15, %v477_v14 }
 0x1f3   :  { %v392_v3 = vpop.xlane.xlu1 %391  ;;  %v383_v20 = vpop.xlane.xlu0 %382  ;;  %v6056_v38 = vld [vmem:[#allocation7_spill] sm:$0xff] }
 0x1f4   :  { %526 = vadd.xlane.f32.xlu1 %v525_v54  ;;  %v415_v62 = vsel %vm4125_vm3, %v392_v3, %v344_v26  ;;  %v416_v27 = vsel %vm4129_vm4, %v392_v3, %v344_v26  ;;  %v409_v7 = vsel %vm4125_vm3, %v383_v20, %v335_v58  ;;  %v410_v9 = vsel %vm4129_vm4, %v383_v20, %v335_v58 }
 0x1f5   :  { %v4604_v16 = vsub.f32 %v4270_v46, %v415_v62  ;;  %v4607_v6 = vsub.f32 %v4275_v47, %v416_v27  ;;  %v4614_v1 = vsub.f32 %v4250_v33, %v409_v7  ;;  %v4617_v19 = vsub.f32 %v4255_v34, %v410_v9 }
 0x1f6   :  { %523 = vadd.xlane.f32.xlu0 %v522_v44  ;;  %v485_v46 = vsel %vm4151_vm5, 0.0, %v461_v24  ;;  %v486_v47 = vsel %vm4155_vm6, 0.0, %v462_v25  ;;  %v483_v33 = vsel %vm4117_vm1, 0.0, %v459_v5  ;;  %v484_v34 = vsel %vm4121_vm2, 0.0, %v460_v8 }
 0x1f7   :  { %v463_v41 = vmul.f32 %v4604_v16, %v4604_v16  ;;  %v464_v43 = vmul.f32 %v4607_v6, %v4607_v6  ;;  %v457_v17 = vmul.f32 %v4614_v1, %v4614_v1  ;;  %v458_v26 = vmul.f32 %v4617_v19, %v4617_v19 }
 0x1f8   :  { %559 = vadd.xlane.f32.xlu1 %v558_v2  ;;  %v569_v24 = vadd.f32 %v486_v47, %v485_v46  ;;  %v566_v58 = vadd.f32 %v484_v34, %v483_v33  ;;  %v5922_v2 = vmov 1  }
 0x1f9   :  { %v528_v25 = vsel %vm116_vm0, %v463_v41, 0.0  ;;  %v529_v10 = vsel %vm116_vm0, %v464_v43, 0.0  ;;  %v487_v5 = vsel %vm4125_vm3, 0.0, %v463_v41  ;;  %v488_v8 = vsel %vm4129_vm4, 0.0, %v464_v43  ;;  %3963 = vset.pattern.permute.xlu1 %v5922_v2  ;;  %3962 = vset.pattern.permute.xlu0 %v5922_v2 }
 0x1fa   :  { %556 = vadd.xlane.f32.xlu0 %v555_v51  ;;  %v517_v54 = vsel %vm116_vm0, %v457_v17, 0.0  ;;  %v518_v44 = vsel %vm116_vm0, %v458_v26, 0.0  ;;  %v530_v3 = vadd.f32 %v529_v10, %v528_v25  ;;  %v481_v22 = vsel %vm4125_vm3, 0.0, %v457_v17 }
 0x1fb   :  { %v482_v23 = vsel %vm4129_vm4, 0.0, %v458_v26  ;;  %v572_v62 = vsel %vm116_vm0, %v487_v5, 0.0  ;;  %v573_v27 = vsel %vm116_vm0, %v488_v8, 0.0  ;;  %v519_v20 = vadd.f32 %v518_v44, %v517_v54 }
 0x1fc   :  { %570 = vadd.xlane.f32.xlu1 %v569_v24  ;;  %v561_v14 = vsel %vm116_vm0, %v481_v22, 0.0  ;;  %v562_v15 = vsel %vm116_vm0, %v482_v23, 0.0  ;;  %v574_v7 = vadd.f32 %v573_v27, %v572_v62 }
 0x1fd   :  { %v563_v9 = vadd.f32 %v562_v15, %v561_v14 }
 0x1fe   :  { %567 = vadd.xlane.f32.xlu0 %v566_v58 }
 0x200   :  { %531 = vadd.xlane.f32.xlu1 %v530_v3 }
 0x202   :  { %520 = vadd.xlane.f32.xlu0 %v519_v20 }
 0x204   :  { %575 = vadd.xlane.f32.xlu1 %v574_v7 }
 0x206   :  { %564 = vadd.xlane.f32.xlu0 %v563_v9 }
 0x265   :  { %v494_v46 = vpop.xlane.xlu1 %493  ;;  %v491_v47 = vpop.xlane.xlu0 %490 }
 0x269   :  { %v505_v41 = vpop.xlane.xlu1 %504  ;;  %v502_v43 = vpop.xlane.xlu0 %501 }
 0x26d   :  { %v538_v51 = vpop.xlane.xlu1 %537  ;;  %v535_v33 = vpop.xlane.xlu0 %534 }
 0x26e   :  { %v578_v34 = vsub.f32 %v494_v46, %v538_v51  ;;  %v577_v17 = vsub.f32 %v491_v47, %v535_v33  ;;  %v590_v8 = vmul.f32 %v538_v51, %v4305_v29  ;;  %v589_v44 = vmul.f32 %v535_v33, %v4315_v35 }
 0x270   :  { %v602_v10 = vmul.f32 %v578_v34, %v4310_v30  ;;  %v601_v58 = vmul.f32 %v577_v17, %v4300_v28 }
 0x271   :  { %v549_v26 = vpop.xlane.xlu1 %548  ;;  %v546_v24 = vpop.xlane.xlu0 %545 }
 0x272   :  { %v581_v25 = vsub.f32 %v505_v41, %v549_v26  ;;  %v580_v5 = vsub.f32 %v502_v43, %v546_v24  ;;  %v593_v3 = vmul.f32 %v549_v26, %v4305_v29  ;;  %v592_v22 = vmul.f32 %v546_v24, %v4315_v35 }
 0x273   :  { %v614_v20 = vadd.f32 %v602_v10, %v590_v8  ;;  %v613_v14 = vadd.f32 %v601_v58, %v589_v44 }
 0x274   :  { %v605_v54 = vmul.f32 %v581_v25, %v4310_v30  ;;  %v604_v23 = vmul.f32 %v580_v5, %v4300_v28 }
 0x275   :  { %v510_v62 = vpop.xlane.xlu1 %509  ;;  %v499_v27 = vpop.xlane.xlu0 %498  ;;  %v626_v43 = vsel %vm247_vm7, %v614_v20, 0.0  ;;  %v625_v51 = vsel %vm247_vm7, %v613_v14, 0.0 }
 0x276   :  { %v617_v15 = vadd.f32 %v605_v54, %v593_v3  ;;  %v616_v7 = vadd.f32 %v604_v23, %v592_v22  ;;  %v627_v5 = vadd.f32 %v626_v43, %v625_v51 }
 0x278   :  { %v637_v33 = vsel %vm247_vm7, %v617_v15, 0.0  ;;  %v636_v34 = vsel %vm247_vm7, %v616_v7, 0.0 }
 0x279   :  { %v554_v9 = vpop.xlane.xlu1 %553  ;;  %v543_v46 = vpop.xlane.xlu0 %542  ;;  %v638_v8 = vadd.f32 %v637_v33, %v636_v34 }
 0x27a   :  { %v582_v47 = vsub.f32 %v510_v62, %v554_v9  ;;  %v579_v41 = vsub.f32 %v499_v27, %v543_v46  ;;  %v594_v17 = vmul.f32 %v554_v9, %v4325_v55  ;;  %v591_v24 = vmul.f32 %v543_v46, %v4325_v55 }
 0x27c   :  { %v606_v26 = vmul.f32 %v582_v47, %v4330_v56  ;;  %v603_v25 = vmul.f32 %v579_v41, %v4330_v56 }
 0x27d   :  { %v516_v62 = vpop.xlane.xlu1 %515 }
 0x27e   :  { %v618_v10 = vadd.f32 %v606_v26, %v594_v17  ;;  %v615_v58 = vadd.f32 %v603_v25, %v591_v24 }
 0x27f   :  { %v513_v54 = vpop.xlane.xlu0 %512 }
 0x280   :  { %v639_v44 = vsel %vm251_vm8, %v618_v10, 0.0  ;;  %v628_v3 = vsel %vm251_vm8, %v615_v58, 0.0 }
 0x281   :  { %v640_v22 = vadd.f32 %v639_v44, %v638_v8  ;;  %v629_v23 = vadd.f32 %v628_v3, %v627_v5  ;;  %v527_v47 = vpop.xlane.xlu1 %526 }
 0x283   :  { %v641_v27 = vrot.slane %v640_v22, 4  ;;  %v630_v20 = vrot.slane %v629_v23, 4  ;;  %v524_v14 = vpop.xlane.xlu0 %523 }
 0x285   :  { %v642_v15 = vadd.f32 %v641_v27, %v640_v22  ;;  %v631_v7 = vadd.f32 %v630_v20, %v629_v23  ;;  %v560_v24 = vpop.xlane.xlu1 %559 }
 0x286   :  { %v584_v44 = vsub.f32 %v516_v62, %v560_v24 }
 0x287   :  { %v643_v9 = vrot.slane %v642_v15, 2  ;;  %v632_v46 = vrot.slane %v631_v7, 2  ;;  %v557_v43 = vpop.xlane.xlu0 %556 }
 0x288   :  { %v583_v23 = vsub.f32 %v513_v54, %v557_v43 }
 0x289   :  { %v644_v41 = vadd.f32 %v643_v9, %v642_v15  ;;  %v633_v17 = vadd.f32 %v632_v46, %v631_v7  ;;  %v571_v5 = vpop.xlane.xlu1 %570  ;;  %v608_v7 = vmul.f32 %v584_v44, %v4310_v30  ;;  %v596_v44 = vmul.f32 %v560_v24, %v4305_v29 }
 0x28a   :  { %v607_v62 = vmul.f32 %v583_v23, %v4300_v28  ;;  %v587_v36 = vsub.f32 %v527_v47, %v571_v5 }
 0x28b   :  { %v645_v51 = vrot.slane %v644_v41, 1  ;;  %v634_v33 = vrot.slane %v633_v17, 1  ;;  %v568_v58 = vpop.xlane.xlu0 %567 }
 0x28d   :  { %v646_v34 = vadd.f32 %v645_v51, %v644_v41  ;;  %v635_v26 = vadd.f32 %v634_v33, %v633_v17  ;;  %v532_v3 = vpop.xlane.xlu1 %531 }
 0x28f   :  { %v670_v25 = vmul.f32 0.003690037, %v646_v34  ;;  %v669_v10 = vmul.f32 0.003690037, %v635_v26  ;;  %v521_v8 = vpop.xlane.xlu0 %520 }
 0x291   :  { %3972 = vrsqrt.f32 %v670_v25  ;;  %vm682_vm9 = vcmp.eq.f32.partialorder %v670_v25, inf  ;;  %vm684_vm10 = vcmp.eq.f32.partialorder %v670_v25, 0.0  ;;  %v685_v9 = vand.u32 2147483648, %v670_v25  ;;  %v576_v26 = vpop.xlane.xlu1 %575 }
 0x292   :  { %3974 = vrsqrt.f32 %v669_v10  ;;  %vm675_vm11 = vcmp.eq.f32.partialorder %v669_v10, inf  ;;  %v678_v17 = vand.u32 2147483648, %v669_v10  ;;  %vm677_vm12 = vcmp.eq.f32.partialorder %v669_v10, 0.0 }
 0x293   :  { %v565_v27 = vpop.xlane.xlu0 %564 }
 0x294   :  { %v585_v51 = vsub.f32 %v521_v8, %v565_v27  ;;  %v620_v8 = vadd.f32 %v608_v7, %v596_v44 }
 0x29b   :  { %v3973_v22 = vpop.eup %3972 }
 0x29c   :  { %v3975_v20 = vpop.eup %3974  ;;  %v681_v15 = vmul.f32 %v3973_v22, %v670_v25  ;;  %v586_v22 = vsub.f32 %v524_v14, %v568_v58  ;;  %v599_v14 = vmul.f32 %v571_v5, %v4305_v29 }
 0x29d   :  { %v674_v46 = vmul.f32 %v3975_v20, %v669_v10  ;;  %v595_v20 = vmul.f32 %v557_v43, %v4315_v35  ;;  %v648_v43 = vsel %vm247_vm7, %v620_v8, 0.0  ;;  %v4704_v8 = vld [vmem:[%s5918_s3 + $0x8] sm:$0xff] }
 0x29e   :  { %v683_v41 = vsel %vm682_vm9, %v670_v25, %v681_v15  ;;  %v588_v25 = vsub.f32 %v532_v3, %v576_v26  ;;  %v609_v15 = vmul.f32 %v585_v51, %v4330_v56  ;;  %v610_v23 = vmul.f32 %v586_v22, %v4300_v28 }
 0x29f   :  { %v686_v33 = vsel %vm684_vm10, %v685_v9, %v683_v41  ;;  %v676_v34 = vsel %vm675_vm11, %v669_v10, %v674_v46  ;;  %v619_v9 = vadd.f32 %v607_v62, %v595_v20  ;;  %v611_v10 = vmul.f32 %v587_v36, %v4310_v30 }
 0x2a0   :  { %v702_v54 = vadd.f32 1e-10, %v686_v33  ;;  %v679_v2 = vsel %vm677_vm12, %v678_v17, %v676_v34  ;;  %v597_v46 = vmul.f32 %v565_v27, %v4325_v55  ;;  %v612_v47 = vmul.f32 %v588_v25, %v4330_v56 }
 0x2a1   :  { %v701_v45 = vadd.f32 1e-10, %v679_v2  ;;  %v598_v2 = vmul.f32 %v568_v58, %v4315_v35  ;;  %v647_v3 = vsel %vm247_vm7, %v619_v9, 0.0  ;;  %v600_v41 = vmul.f32 %v576_v26, %v4325_v55 }
 0x2a2   :  { %3976 = vrcp.f32 %v702_v54  ;;  %v621_v24 = vadd.f32 %v609_v15, %v597_v46  ;;  %v649_v36 = vadd.f32 %v648_v43, %v647_v3 }
 0x2a3   :  { %3978 = vrcp.f32 %v701_v45  ;;  %v623_v45 = vadd.f32 %v611_v10, %v599_v14  ;;  %v622_v7 = vadd.f32 %v610_v23, %v598_v2  ;;  %v624_v30 = vadd.f32 %v612_v47, %v600_v41 }
 0x2a4   :  { %v650_v28 = vsel %vm251_vm8, %v621_v24, 0.0 }
 0x2a5   :  { %v659_v5 = vsel %vm247_vm7, %v623_v45, 0.0  ;;  %v658_v58 = vsel %vm247_vm7, %v622_v7, 0.0  ;;  %v651_v17 = vadd.f32 %v650_v28, %v649_v36  ;;  %v661_v51 = vsel %vm251_vm8, %v624_v30, 0.0  ;;  %v4724_v7 = vld [vmem:[%s5919_s2 + $0x10] sm:$0x1] }
 0x2a6   :  { %v660_v62 = vadd.f32 %v659_v5, %v658_v58 }
 0x2a7   :  { %v652_v20 = vrot.slane %v651_v17, 4 }
 0x2a8   :  { %v662_v44 = vadd.f32 %v661_v51, %v660_v62 }
 0x2a9   :  { %v653_v23 = vadd.f32 %v652_v20, %v651_v17  ;;  %v4734_v17 = vld [vmem:[%s5918_s3 + $0x10] sm:$0x1]  ;;  %v4741_v20 = vld [vmem:[%s5916_s1 + $0x8] sm:$0xff] }
 0x2aa   :  { %v663_v10 = vrot.slane %v662_v44, 4 }
 0x2ab   :  { %v654_v43 = vrot.slane %v653_v23, 2 }
 0x2ac   :  { %v4686_v27 = vpop.eup %3976  ;;  %v664_v24 = vadd.f32 %v663_v10, %v662_v44  ;;  %v4000_v10 = vmov 0  }
 0x2ad   :  { %v3979_v56 = vpop.eup %3978  ;;  %v717_v54 = vmul.f32 %v4686_v27, %v4305_v29  ;;  %v716_v22 = vmul.f32 %v4686_v27, %v4315_v35  ;;  %v765_v2 = vmul.f32 %v4704_v8, %v4686_v27  ;;  %v718_v41 = vmul.f32 %v4724_v7, %v4686_v27 }
 0x2ae   :  { %v714_v33 = vmul.f32 %v3979_v56, %v4305_v29  ;;  %v713_v34 = vmul.f32 %v3979_v56, %v4315_v35  ;;  %v762_v9 = vmul.f32 %v4704_v8, %v3979_v56  ;;  %v4710_v29 = vld [vmem:[%s5918_s3] sm:$0xff]  ;;  %v715_v30 = vmul.f32 %v4724_v7, %v3979_v56 }
 0x2af   :  { %v737_v25 = vsel %vm247_vm7, %v717_v54, 0.0  ;;  %v734_v15 = vsel %vm247_vm7, %v716_v22, 0.0  ;;  %v761_v35 = vmul.f32 %v4710_v29, %v3979_v56  ;;  %v764_v47 = vmul.f32 %v4710_v29, %v4686_v27 }
 0x2b0   :  { %v728_v55 = vsel %vm247_vm7, %v714_v33, 0.0  ;;  %v725_v26 = vsel %vm247_vm7, %v713_v34, 0.0  ;;  %v776_v46 = vsel %vm247_vm7, %v762_v9, 0.0  ;;  %v785_v3 = vsel %vm247_vm7, %v765_v2, 0.0 }
 0x2b1   :  { %729 = vadd.xlane.f32.xlu1 %v728_v55  ;;  %726 = vadd.xlane.f32.xlu0 %v725_v26  ;;  %v773_v14 = vsel %vm247_vm7, %v761_v35, 0.0  ;;  %v782_v45 = vsel %vm247_vm7, %v764_v47, 0.0  ;;  %v665_v28 = vrot.slane %v664_v24, 2  ;;  %v655_v36 = vadd.f32 %v654_v43, %v653_v23 }
 0x2b2   :  { %v740_v5 = vsel %vm251_vm8, %v718_v41, 0.0  ;;  %v731_v58 = vsel %vm251_vm8, %v715_v30, 0.0  ;;  %v763_v51 = vmul.f32 %v4734_v17, %v3979_v56  ;;  %v3999_v56 = vmov 2   ;;  %v3994_v30 = vld [vmem:[%s5919_s2] sm:$0xff] }
 0x2b3   :  { %v666_v33 = vadd.f32 %v665_v28, %v664_v24  ;;  %v656_v34 = vrot.slane %v655_v36, 1 }
 0x2b4   :  { %v779_v62 = vsel %vm251_vm8, %v763_v51, 0.0 }
 0x2b5   :  { %738 = vadd.xlane.f32.xlu1 %v737_v25  ;;  %735 = vadd.xlane.f32.xlu0 %v734_v15  ;;  %v667_v55 = vrot.slane %v666_v33, 1  ;;  %v657_v26 = vadd.f32 %v656_v34, %v655_v36  ;;  %v4748_v15 = vld [vmem:[%s5916_s1] sm:$0xff]  ;;  %v3995_v34 = vld [vmem:[%s5919_s2 + $0x8] sm:$0xff] }
 0x2b7   :  { %v668_v54 = vadd.f32 %v667_v55, %v666_v33  ;;  %v671_v22 = vmul.f32 0.003690037, %v657_v26 }
 0x2b9   :  { %777 = vadd.xlane.f32.xlu1 %v776_v46  ;;  %774 = vadd.xlane.f32.xlu0 %v773_v14  ;;  %v672_v44 = vmul.f32 0.003690037, %v668_v54  ;;  %3980 = vrsqrt.f32 %v671_v22  ;;  %vm689_vm13 = vcmp.eq.f32.partialorder %v671_v22, inf  ;;  %v692_v14 = vand.u32 2147483648, %v671_v22 }
 0x2ba   :  { %vm691_vm14 = vcmp.eq.f32.partialorder %v671_v22, 0.0 }
 0x2bb   :  { %3982 = vrsqrt.f32 %v672_v44  ;;  %vm696_vm15 = vcmp.eq.f32.partialorder %v672_v44, inf  ;;  %v699_v24 = vand.u32 2147483648, %v672_v44  ;;  %vm698_vm9 = vcmp.eq.f32.partialorder %v672_v44, 0.0 }
 0x2bd   :  { %786 = vadd.xlane.f32.xlu1 %v785_v3  ;;  %783 = vadd.xlane.f32.xlu0 %v782_v45 }
 0x2c1   :  { %741 = vadd.xlane.f32.xlu1 %v740_v5  ;;  %732 = vadd.xlane.f32.xlu0 %v731_v58  ;;  %v766_v5 = vmul.f32 %v4734_v17, %v4686_v27 }
 0x2c3   :  { %v3981_v25 = vpop.eup %3980  ;;  %v788_v33 = vsel %vm251_vm8, %v766_v5, 0.0 }
 0x2c4   :  { %v688_v9 = vmul.f32 %v3981_v25, %v671_v22 }
 0x2c5   :  { %780 = vadd.xlane.f32.xlu0 %v779_v62  ;;  %v3983_v35 = vpop.eup %3982 }
 0x2c6   :  { %v695_v23 = vmul.f32 %v3983_v35, %v672_v44  ;;  %v690_v46 = vsel %vm689_vm13, %v671_v22, %v688_v9 }
 0x2c7   :  { %v693_v2 = vsel %vm691_vm14, %v692_v14, %v690_v46 }
 0x2c8   :  { %v697_v47 = vsel %vm696_vm15, %v672_v44, %v695_v23  ;;  %v703_v43 = vadd.f32 1e-10, %v693_v2 }
 0x2c9   :  { %v700_v3 = vsel %vm698_vm9, %v699_v24, %v697_v47 }
 0x2ca   :  { %v704_v45 = vadd.f32 1e-10, %v700_v3  ;;  %3984 = vrcp.f32 %v703_v43 }
 0x2cc   :  { %3986 = vrcp.f32 %v704_v45 }
 0x2d2   :  { %1008 = vperm.xlu1 %3963, %v4741_v20  }
 0x2d4   :  { %v3985_v41 = vpop.eup %3984 }
 0x2d5   :  { %v719_v28 = vmul.f32 %v3994_v30, %v3985_v41  ;;  %v720_v62 = vmul.f32 %v3995_v34, %v3985_v41  ;;  %v767_v26 = vmul.f32 %v4710_v29, %v3985_v41  ;;  %v768_v9 = vmul.f32 %v4704_v8, %v3985_v41 }
 0x2d6   :  { %3964 = vset.pattern.permute.xlu1 %v3999_v56  ;;  %v3987_v36 = vpop.eup %3986  ;;  %v721_v24 = vmul.f32 %v4724_v7, %v3985_v41 }
 0x2d7   :  { %1041 = vperm.xlu1 %3964, %v4748_v15   ;;  %v743_v58 = vsel %vm247_vm7, %v719_v28, 0.0  ;;  %v722_v51 = vmul.f32 %v3994_v30, %v3987_v36  ;;  %v746_v54 = vsel %vm247_vm7, %v720_v62, 0.0  ;;  %v723_v27 = vmul.f32 %v3995_v34, %v3987_v36 }
 0x2d8   :  { %v791_v22 = vsel %vm247_vm7, %v767_v26, 0.0  ;;  %v770_v44 = vmul.f32 %v4710_v29, %v3987_v36  ;;  %v724_v23 = vmul.f32 %v4724_v7, %v3987_v36  ;;  %v794_v46 = vsel %vm247_vm7, %v768_v9, 0.0 }
 0x2d9   :  { %v752_v55 = vsel %vm247_vm7, %v722_v51, 0.0  ;;  %v755_v25 = vsel %vm247_vm7, %v723_v27, 0.0  ;;  %v771_v14 = vmul.f32 %v4704_v8, %v3987_v36  ;;  %v769_v29 = vmul.f32 %v4734_v17, %v3985_v41 }
 0x2da   :  { %v800_v35 = vsel %vm247_vm7, %v770_v44, 0.0  ;;  %v758_v2 = vsel %vm251_vm8, %v724_v23, 0.0  ;;  %v749_v3 = vsel %vm251_vm8, %v721_v24, 0.0  ;;  %v772_v45 = vmul.f32 %v4734_v17, %v3987_v36 }
 0x2db   :  { %1003 = vperm.xlu0 %3962, %v4748_v15   ;;  %3966 = vset.pattern.permute.xlu1 %v4000_v10  ;;  %v803_v47 = vsel %vm247_vm7, %v771_v14, 0.0  ;;  %v797_v43 = vsel %vm251_vm8, %v769_v29, 0.0  ;;  %v6014_v36 = vmov 1   ;;  %vm1160_vm7 = vcmask 138240  }
 0x2dc   :  { %v806_v8 = vsel %vm251_vm8, %v772_v45, 0.0 }
 0x2df   :  { %3965 = vset.pattern.permute.xlu0 %v4000_v10 }
 0x2fa   :  { %744 = vadd.xlane.f32.xlu0 %v743_v58 }
 0x2fb   :  { %789 = vadd.xlane.f32.xlu1 %v788_v33 }
 0x2fe   :  { %753 = vadd.xlane.f32.xlu0 %v752_v55  ;;  %v4790_v55 = vld [vmem:[%s5916_s1 + $0x10] sm:$0x1] }
 0x2ff   :  { %747 = vadd.xlane.f32.xlu1 %v746_v54 }
 0x302   :  { %792 = vadd.xlane.f32.xlu0 %v791_v22 }
 0x303   :  { %756 = vadd.xlane.f32.xlu1 %v755_v25 }
 0x306   :  { %801 = vadd.xlane.f32.xlu0 %v800_v35 }
 0x307   :  { %795 = vadd.xlane.f32.xlu1 %v794_v46 }
 0x30a   :  { %759 = vadd.xlane.f32.xlu0 %v758_v2 }
 0x30b   :  { %804 = vadd.xlane.f32.xlu1 %v803_v47 }
 0x30e   :  { %798 = vadd.xlane.f32.xlu0 %v797_v43 }
 0x30f   :  { %750 = vadd.xlane.f32.xlu1 %v749_v3 }
 0x313   :  { %807 = vadd.xlane.f32.xlu1 %v806_v8 }
 0x33e   :  { %v730_v30 = vpop.xlane.xlu1 %729  ;;  %v727_v28 = vpop.xlane.xlu0 %726 }
 0x33f   :  { %v809_v54 = vmul.f32 %v4748_v15, %v727_v28  ;;  %v810_v27 = vmul.f32 %v4741_v20, %v730_v30 }
 0x342   :  { %v739_v5 = vpop.xlane.xlu1 %738  ;;  %v736_v58 = vpop.xlane.xlu0 %735 }
 0x343   :  { %v812_v44 = vmul.f32 %v4748_v15, %v736_v58  ;;  %v813_v25 = vmul.f32 %v4741_v20, %v739_v5 }
 0x346   :  { %v778_v51 = vpop.xlane.xlu1 %777  ;;  %v775_v33 = vpop.xlane.xlu0 %774 }
 0x347   :  { %v822_v7 = vmul.f32 %v4741_v20, %v778_v51  ;;  %v821_v41 = vmul.f32 %v4748_v15, %v775_v33 }
 0x349   :  { %840 = vperm.xlu1 %3966, %v822_v7   ;;  %835 = vperm.xlu0 %3965, %v821_v41  }
 0x34a   :  { %v784_v34 = vpop.xlane.xlu0 %783  ;;  %v787_v17 = vpop.xlane.xlu1 %786 }
 0x34b   :  { %v824_v62 = vmul.f32 %v4748_v15, %v784_v34  ;;  %v825_v26 = vmul.f32 %v4741_v20, %v787_v17 }
 0x34d   :  { %850 = vperm.xlu1 %3966, %v824_v62   ;;  %3968 = vset.pattern.permute.xlu0 %v6014_v36 }
 0x34e   :  { %1013 = vperm.xlu0 %3968, %v4790_v55   ;;  %v733_v22 = vpop.xlane.xlu0 %732  ;;  %v742_v23 = vpop.xlane.xlu1 %741 }
 0x34f   :  { %v811_v45 = vmul.f32 %v4790_v55, %v733_v22  ;;  %v814_v5 = vmul.f32 %v4790_v55, %v742_v23 }
 0x351   :  { %855 = vperm.xlu1 %3966, %v825_v26  }
 0x352   :  { %3969 = vset.pattern.permute.xlu0 %v4000_v10  ;;  %v781_v9 = vpop.xlane.xlu0 %780  ;;  %v4800_v46 = vpop.permute.xlu1 %1008 }
 0x353   :  { %v823_v35 = vmul.f32 %v4790_v55, %v781_v9  ;;  %6015 = vst [vmem:[#allocation12_spill] sm:$0xff] %v4800_v46 }
 0x355   :  { %895 = vperm.xlu1 %3966, %v809_v54  }
 0x356   :  { %v4804_v2 = vpop.permute.xlu1 %1041 }
 0x357   :  { %6017 = vst [vmem:[#allocation14_spill] sm:$0xff] %v4804_v2 }
 0x359   :  { %900 = vperm.xlu1 %3966, %v810_v27  }
 0x35a   :  { %v4802_v14 = vpop.permute.xlu0 %1003 }
 0x35b   :  { %6016 = vst [vmem:[#allocation13_spill] sm:$0xff] %v4802_v14 }
 0x35d   :  { %910 = vperm.xlu1 %3966, %v812_v44  }
 0x361   :  { %915 = vperm.xlu1 %3966, %v813_v25  }
 0x365   :  { %845 = vperm.xlu1 %3966, %v823_v35  }
 0x387   :  { %v745_v29 = vpop.xlane.xlu0 %744 }
 0x388   :  { %v790_v47 = vpop.xlane.xlu1 %789  ;;  %v815_v22 = vmul.f32 %v4748_v15, %v745_v29 }
 0x389   :  { %v826_v24 = vmul.f32 %v4790_v55, %v790_v47 }
 0x38b   :  { %860 = vperm.xlu1 %3966, %v826_v24   ;;  %v754_v43 = vpop.xlane.xlu0 %753 }
 0x38c   :  { %v748_v3 = vpop.xlane.xlu1 %747  ;;  %v818_v25 = vmul.f32 %v4748_v15, %v754_v43 }
 0x38d   :  { %v816_v41 = vmul.f32 %v4741_v20, %v748_v3  ;;  %v1148_v3 = vld [vmem:[%s5920_s4] sm:$0xff] }
 0x38f   :  { %905 = vperm.xlu1 %3966, %v811_v45   ;;  %v793_v8 = vpop.xlane.xlu0 %792 }
 0x390   :  { %v827_v30 = vmul.f32 %v4748_v15, %v793_v8  ;;  %v757_v28 = vpop.xlane.xlu1 %756  ;;  %v1162_v8 = vsel %vm1160_vm7, %v1148_v3, 0 }
 0x391   :  { %v819_v17 = vmul.f32 %v4741_v20, %v757_v28  ;;  %v1151_v28 = vld [vmem:[%s5920_s4 + $0x18] sm:$0xff] }
 0x392   :  { %865 = vperm.xlu0 %3969, %v827_v30  }
 0x393   :  { %920 = vperm.xlu1 %3966, %v814_v5   ;;  %v802_v62 = vpop.xlane.xlu0 %801 }
 0x394   :  { %v796_v58 = vpop.xlane.xlu1 %795  ;;  %v830_v26 = vmul.f32 %v4748_v15, %v802_v62 }
 0x395   :  { %v828_v34 = vmul.f32 %v4741_v20, %v796_v58 }
 0x397   :  { %3967 = vset.pattern.permute.xlu1 %v3999_v56  ;;  %v760_v27 = vpop.xlane.xlu0 %759 }
 0x398   :  { %v805_v51 = vpop.xlane.xlu1 %804  ;;  %1045 = vperm.xlu1 %3967, %v4741_v20   ;;  %v820_v44 = vmul.f32 %v4790_v55, %v760_v27 }
 0x399   :  { %v831_v33 = vmul.f32 %v4741_v20, %v805_v51  ;;  %v5926_v20 = vmov 0.0  }
 0x39a   :  { %1246 = vmatprep.mubr.f32.mxu0 %v5926_v20  ;;  %1876 = vmatprep.mubr.f32.mxu1 %v5926_v20 }
 0x39b   :  { %885 = vperm.xlu0 %3969, %v831_v33  }
 0x39c   :  { %v751_v7 = vpop.xlane.xlu1 %750  ;;  %1049 = vperm.xlu1 %3967, %v4790_v55  }
 0x39d   :  { %v817_v35 = vmul.f32 %v4790_v55, %v751_v7  ;;  %v4849_v7 = vand.u32 4294901760, %v1162_v8 }
 0x39f   :  { %930 = vperm.xlu0 %3969, %v816_v41   ;;  %v1792_v41 = vsel %vm1160_vm7, %v1151_v28, 0 }
 0x3a0   :  { %3970 = vset.pattern.permute.xlu1 %v4000_v10  ;;  %v808_v36 = vpop.xlane.xlu1 %807  ;;  %v799_v10 = vpop.xlane.xlu0 %798  ;;  %v4865_v27 = vand.u32 4294901760, %v1792_v41 }
 0x3a1   :  { %870 = vperm.xlu1 %3970, %v828_v34   ;;  %v832_v54 = vmul.f32 %v4790_v55, %v808_v36  ;;  %v829_v9 = vmul.f32 %v4790_v55, %v799_v10  ;;  %v1152_v36 = vld [vmem:[%s5920_s4 + $0x20] sm:$0xff] }
 0x3a3   :  { %945 = vperm.xlu0 %3969, %v819_v17  }
 0x3a5   :  { %880 = vperm.xlu1 %3970, %v830_v26  }
 0x3a7   :  { %890 = vperm.xlu0 %3969, %v832_v54   ;;  %v4863_v54 = vsub.f32 %v1162_v8, %v4849_v7 }
 0x3a9   :  { %925 = vperm.xlu1 %3970, %v815_v22   ;;  %6018 = vst [vmem:[#allocation15_spill] sm:$0xff] %v4863_v54 }
 0x3ab   :  { %950 = vperm.xlu0 %3969, %v820_v44  }
 0x3ad   :  { %940 = vperm.xlu1 %3970, %v818_v25  }
 0x3af   :  { %3971 = vset.pattern.permute.xlu0 %v3999_v56 }
 0x3b1   :  { %875 = vperm.xlu1 %3970, %v829_v9  }
 0x3b5   :  { %935 = vperm.xlu1 %3970, %v817_v35   ;;  %v5925_v35 = vand.u32 4294901760, %v4863_v54 }
 0x3c8   :  { %v4828_v23 = vpop.permute.xlu1 %840  ;;  %v836_v45 = vpop.permute.xlu0 %835 }
 0x3cc   :  { %v851_v29 = vpop.permute.xlu1 %850 }
 0x3d0   :  { %v4830_v15 = vpop.permute.xlu1 %855 }
 0x3d4   :  { %v896_v47 = vpop.permute.xlu1 %895 }
 0x3d5   :  { %v954_v56 = vsel %vm4121_vm2, %v836_v45, %v896_v47  ;;  %v953_v51 = vsel %vm4117_vm1, %v836_v45, %v896_v47 }
 0x3d6   :  { %v978_v5 = vmul.f32 %v954_v56, %v4437_v53  ;;  %v977_v34 = vmul.f32 %v953_v51, %v4434_v52  ;;  %v1150_v56 = vld [vmem:[%s5920_s4 + $0x10] sm:$0x1] }
 0x3d8   :  { %v901_v24 = vpop.permute.xlu1 %900  ;;  %v1017_v62 = vadd.f32 %v4802_v14, %v978_v5  ;;  %v1016_v22 = vadd.f32 %v4802_v14, %v977_v34 }
 0x3d9   :  { %v955_v8 = vsel %vm4151_vm5, %v4828_v23, %v901_v24  ;;  %v956_v28 = vsel %vm4155_vm6, %v4828_v23, %v901_v24  ;;  %v4913_v24 = vpop.permute.xlu0 %1013 }
 0x3da   :  { %v1053_v44 = vmul.f32 %v4804_v2, %v1017_v62  ;;  %v1052_v3 = vmul.f32 %v4804_v2, %v1016_v22 }
 0x3dc   :  { %v911_v43 = vpop.permute.xlu1 %910  ;;  %vm1077_vm8 = vcmp.ge.f32.partialorder %v1053_v44, 0.0  ;;  %vm1076_vm11 = vcmp.ge.f32.partialorder %v1052_v3, 0.0 }
 0x3dd   :  { %v960_v55 = vsel %vm4121_vm2, %v851_v29, %v911_v43  ;;  %v959_v33 = vsel %vm4117_vm1, %v851_v29, %v911_v43  ;;  %v4875_v29 = vsub.f32 %v1792_v41, %v4865_v27 }
 0x3de   :  { %v984_v58 = vmul.f32 %v960_v55, %v4465_v0  ;;  %v983_v17 = vmul.f32 %v959_v33, %v4462_v61  ;;  %v1149_v0 = vld [vmem:[%s5920_s4 + $0x8] sm:$0xff]  ;;  %v1795_v61 = vsel %vm1160_vm7, %v1152_v36, 0  ;;  %v4920_v36 = vsel %vm1160_vm7, %v1150_v56, 0 }
 0x3df   :  { %v1165_v52 = vsel %vm1160_vm7, %v1149_v0, 0  ;;  %6019 = vst [vmem:[#allocation16_spill] sm:$0xff] %v4875_v29  ;;  %v4879_v43 = vand.u32 4294901760, %v1795_v61  ;;  %v1153_v55 = vld [vmem:[%s5920_s4 + $0x28] sm:$0x1] }
 0x3e0   :  { %v916_v30 = vpop.permute.xlu1 %915  ;;  %v1023_v53 = vadd.f32 %v4802_v14, %v984_v58  ;;  %v1022_v25 = vadd.f32 %v4802_v14, %v983_v17  ;;  %v4877_v47 = vand.u32 4294901760, %v1165_v52  ;;  %v4898_v58 = vsub.f32 %v4863_v54, %v5925_v35 }
 0x3e1   :  { %v961_v33 = vsel %vm4151_vm5, %v4830_v15, %v916_v30  ;;  %v962_v41 = vsel %vm4155_vm6, %v4830_v15, %v916_v30  ;;  %v4911_v23 = vsub.f32 %v1795_v61, %v4879_v43  ;;  %v4915_v17 = vsel %vm1077_vm8, %v1017_v62, 0.0 }
 0x3e2   :  { %v1059_v10 = vmul.f32 %v4804_v2, %v1023_v53  ;;  %v1058_v45 = vmul.f32 %v4804_v2, %v1022_v25  ;;  %v4908_v34 = vsub.f32 %v1165_v52, %v4877_v47  ;;  %6022 = vst [vmem:[#allocation19_spill] sm:$0xff] %v4915_v17  ;;  %v4923_v44 = vsel %vm1160_vm7, %v1153_v55, 0 }
 0x3e3   :  { %6021 = vst [vmem:[#allocation18_spill] sm:$0xff] %v4911_v23  ;;  %v979_v15 = vmul.f32 %v955_v8, %v4424_v59  ;;  %v980_v30 = vmul.f32 %v956_v28, %v4427_v48  ;;  %v985_v52 = vmul.f32 %v961_v33, %v4452_v60  ;;  %v986_v61 = vmul.f32 %v962_v41, %v4455_v63 }
 0x3e4   :  { %v846_v26 = vpop.permute.xlu1 %845  ;;  %vm1083_vm10 = vcmp.ge.f32.partialorder %v1059_v10, 0.0  ;;  %6020 = vst [vmem:[#allocation17_spill] sm:$0xff] %v4908_v34  ;;  %vm1082_vm12 = vcmp.ge.f32.partialorder %v1058_v45, 0.0  ;;  %v1125_v48 = vsub.f32 %v1017_v62, %v4915_v17  ;;  %v4941_v60 = vsel %vm1076_vm11, %v1016_v22, 0.0 }
 0x3e5   :  { %v4917_v0 = vsel %vm1083_vm10, %v1023_v53, 0.0  ;;  %6024 = vst [vmem:[#allocation21_spill] sm:$0xff] %v4941_v60  ;;  %v4943_v63 = vsel %vm1082_vm12, %v1022_v25, 0.0  ;;  %v4946_v45 = vand.u32 4294901760, %v4920_v36  ;;  %v1025_v33 = vadd.f32 %v4800_v46, %v986_v61 }
 0x3e6   :  { %6023 = vst [vmem:[#allocation20_spill] sm:$0xff] %v4917_v0  ;;  %v4939_v3 = vsub.f32 %v1023_v53, %v4917_v0  ;;  %6025 = vst [vmem:[#allocation22_spill] sm:$0xff] %v4943_v63  ;;  %v1018_v53 = vadd.f32 %v4800_v46, %v979_v15  ;;  %v1176_v51 = vand.u32 4294901760, %v1125_v48 }
 0x40a   :  { %v861_v9 = vpop.permute.xlu1 %860 }
 0x40e   :  { %v906_v5 = vpop.permute.xlu1 %905 }
 0x40f   :  { %v957_v10 = vsel %vm4125_vm3, %v846_v26, %v906_v5  ;;  %v958_v56 = vsel %vm4129_vm4, %v846_v26, %v906_v5  ;;  %v4949_v26 = vand.u32 4294901760, %v4923_v44  ;;  %v1024_v5 = vadd.f32 %v4800_v46, %v985_v52 }
 0x410   :  { %v981_v8 = vmul.f32 %v957_v10, %v4500_v12  ;;  %v982_v28 = vmul.f32 %v958_v56, %v4503_v13  ;;  %v1806_v12 = vand.u32 4294901760, %v4939_v3  ;;  %v1124_v13 = vsub.f32 %v1016_v22, %v4941_v60 }
 0x411   :  { %v4959_v41 = vpop.permute.xlu0 %865  ;;  %v5024_v21 = vsub.f32 %v4923_v44, %v4949_v26  ;;  %v6038_v44 = vand.u32 4294901760, %v4875_v29 }
 0x412   :  { %v921_v35 = vpop.permute.xlu1 %920  ;;  %v4973_v61 = vadd.f32 %v4913_v24, %v981_v8  ;;  %v1021_v10 = vadd.f32 %v4913_v24, %v982_v28  ;;  %v5051_v37 = vsub.f32 %v4939_v3, %v1806_v12 }
 0x413   :  { %v963_v55 = vsel %vm4125_vm3, %v861_v9, %v921_v35  ;;  %v964_v59 = vsel %vm4129_vm4, %v861_v9, %v921_v35  ;;  %v1019_v35 = vadd.f32 %v4800_v46, %v980_v30  ;;  %6032 = vst [vmem:[#allocation29_spill] sm:$0xff] %v5024_v21  ;;  %v5026_v46 = vsub.f32 %v1125_v48, %v1176_v51 }
 0x414   :  { %v987_v9 = vmul.f32 %v963_v55, %v4490_v11  ;;  %v988_v62 = vmul.f32 %v964_v59, %v4493_v4  ;;  %v4966_v11 = vsub.f32 %v1022_v25, %v4943_v63  ;;  %v1880_v48 = vsub.f32 %v4875_v29, %v6038_v44 }
 0x416   :  { %v4977_v56 = vadd.f32 %v4913_v24, %v987_v9  ;;  %v4980_v22 = vadd.f32 %v4913_v24, %v988_v62  ;;  %v1808_v2 = vand.u32 4294901760, %v4966_v11 }
 0x417   :  { %v4961_v20 = vpop.permute.xlu1 %1045 }
 0x418   :  { %6026 = vst [vmem:[#allocation23_spill] sm:$0xff] %v4961_v20  ;;  %v1055_v4 = vmul.f32 %v4961_v20, %v1019_v35  ;;  %v1061_v15 = vmul.f32 %v4961_v20, %v1025_v33  ;;  %v1054_v30 = vmul.f32 %v4961_v20, %v1018_v53  ;;  %v1060_v52 = vmul.f32 %v4961_v20, %v1024_v5 }
 0x41a   :  { %v4982_v25 = vpop.permute.xlu0 %885  ;;  %vm1079_vm13 = vcmp.ge.f32.partialorder %v1055_v4, 0.0  ;;  %vm1085_vm14 = vcmp.ge.f32.partialorder %v1061_v15, 0.0  ;;  %vm1078_vm15 = vcmp.ge.f32.partialorder %v1054_v30, 0.0  ;;  %vm1084_vm9 = vcmp.ge.f32.partialorder %v1060_v52, 0.0 }
 0x41b   :  { %6027 = vst [vmem:[#allocation24_spill] sm:$0xff] %v4982_v25  ;;  %v4984_v55 = vpop.permute.xlu1 %1049  ;;  %v4986_v59 = vsel %vm1079_vm13, %v1019_v35, 0.0  ;;  %v4988_v8 = vsel %vm1085_vm14, %v1025_v33, 0.0  ;;  %v4990_v0 = vsel %vm1078_vm15, %v1018_v53, 0.0  ;;  %v4992_v28 = vsel %vm1084_vm9, %v1024_v5, 0.0 }
 0x41c   :  { %6028 = vst [vmem:[#allocation25_spill] sm:$0xff] %v4986_v59  ;;  %6029 = vst [vmem:[#allocation26_spill] sm:$0xff] %v4988_v8  ;;  %v1127_v9 = vsub.f32 %v1019_v35, %v4986_v59  ;;  %v1133_v62 = vsub.f32 %v1025_v33, %v4988_v8  ;;  %v4997_v17 = vsub.f32 %v1018_v53, %v4990_v0  ;;  %v1178_v59 = vand.u32 4294901760, %v1124_v13 }
 0x41d   :  { %6030 = vst [vmem:[#allocation27_spill] sm:$0xff] %v4990_v0  ;;  %6031 = vst [vmem:[#allocation28_spill] sm:$0xff] %v4992_v28  ;;  %v5000_v4 = vsub.f32 %v1024_v5, %v4992_v28  ;;  %v1057_v15 = vmul.f32 %v4984_v55, %v1021_v10  ;;  %v1063_v30 = vmul.f32 %v4984_v55, %v4980_v22 }
 0x41e   :  { %v1056_v52 = vmul.f32 %v4984_v55, %v4973_v61  ;;  %v1062_v63 = vmul.f32 %v4984_v55, %v4977_v56  ;;  %v5009_v35 = vpop.permute.xlu0 %930  ;;  %v1180_v33 = vand.u32 4294901760, %v1127_v9  ;;  %v1810_v8 = vand.u32 4294901760, %v1133_v62 }
 0x41f   :  { %v1182_v53 = vand.u32 4294901760, %v4997_v17  ;;  %vm1081_vm8 = vcmp.ge.f32.partialorder %v1057_v15, 0.0  ;;  %vm1087_vm10 = vcmp.ge.f32.partialorder %v1063_v30, 0.0  ;;  %v5032_v0 = vsub.f32 %v4920_v36, %v4946_v45 }
 0x420   :  { %v5015_v60 = vpop.permute.xlu1 %870  ;;  %v5017_v20 = vpack.c.bf16 %v1180_v33, %v1176_v51  ;;  %v5019_v57 = vpack.c.bf16 %v1810_v8, %v1806_v12  ;;  %v6035_v49 = vand.u32 4294901760, %v5000_v4  ;;  %v5043_v51 = vsel %vm1081_vm8, %v1021_v10, 0.0 }
 0x421   :  { %v5028_v5 = vpack.c.bf16 %v1182_v53, %v1178_v59  ;;  %6034 = vst [vmem:[#allocation31_spill] sm:$0xff] %v5032_v0  ;;  %6037 = vst [vmem:[#allocation33_spill] sm:$0xff] %v5043_v51  ;;  %vm1080_vm11 = vcmp.ge.f32.partialorder %v1056_v52, 0.0  ;;  %vm1086_vm12 = vcmp.ge.f32.partialorder %v1062_v63, 0.0  ;;  %v1129_v36 = vsub.f32 %v1021_v10, %v5043_v51 }
 0x422   :  { %3734 = vmatprep.subr.bf16.mxu0 %v5017_v20  ;;  %3758 = vmatprep.subr.bf16.mxu1 %v5019_v57  ;;  %v5036_v28 = vpop.permute.xlu0 %945  ;;  %v5040_v14 = vpack.c.bf16 %v6035_v49, %v1808_v2  ;;  %v5053_v42 = vsub.f32 %v1124_v13, %v1178_v59  ;;  %v1251_v15 = vand.u32 4294901760, %v4898_v58  ;;  %v5065_v10 = vsel %vm1087_vm10, %v4980_v22, 0.0 }
 0x423   :  { %6033 = vst [vmem:[#allocation30_spill] sm:$0xff] %v5028_v5  ;;  %3736 = vmatpush1.bf16.msra.mxu0 %v5028_v5  ;;  %v5061_v52 = vsel %vm116_vm0, %v1129_v36, 0  ;;  %6039 = vst [vmem:[#allocation34_spill] sm:$0xff] %v5065_v10  ;;  %v5068_v3 = vsel %vm1080_vm11, %v4973_v61, 0.0  ;;  %v5071_v12 = vsel %vm1086_vm12, %v4977_v56, 0.0  ;;  %v6042_v58 = vand.u32 4294901760, %v4908_v34 }
 0x424   :  { %6036 = vst [vmem:[#allocation32_spill] sm:$0xff] %v5040_v14  ;;  %3760 = vmatpush1.bf16.msra.mxu1 %v5040_v14  ;;  %v5056_v49 = vpop.permute.xlu1 %880  ;;  %6040 = vst [vmem:[#allocation35_spill] sm:$0xff] %v5068_v3  ;;  %v6043_v36 = vand.u32 4294901760, %v4911_v23  ;;  %v5082_v51 = vand.u32 4294901760, %v5061_v52  ;;  %v1135_v14 = vsub.f32 %v4980_v22, %v5065_v10  ;;  %v1128_v29 = vsub.f32 %v4973_v61, %v5068_v3 }
 0x425   :  { %6041 = vst [vmem:[#allocation36_spill] sm:$0xff] %v5071_v12  ;;  %v1261_v44 = vsub.f32 %v4908_v34, %v6042_v58  ;;  %v1134_v59 = vsub.f32 %v4977_v56, %v5071_v12  ;;  %v5090_v5 = vsub.f32 %v1127_v9, %v1180_v33  ;;  %v5101_v22 = vsub.f32 %v1133_v62, %v1810_v8 }
 0x426   :  { %v891_v13 = vpop.permute.xlu0 %890  ;;  %v1891_v63 = vsub.f32 %v4911_v23, %v6043_v36  ;;  %v6044_v23 = vand.u32 4294901760, %v5024_v21  ;;  %1185 = vmatprep.subr.mxu0 %v5082_v51  ;;  %v5105_v61 = vsel %vm116_vm0, %v1135_v14, 0  ;;  %v1171_v56 = vsel %vm116_vm0, %v1128_v29, 0 }
 0x427   :  { %v1801_v9 = vsel %vm116_vm0, %v1134_v59, 0  ;;  %v5110_v33 = vsub.f32 %v4997_v17, %v1182_v53  ;;  %v5113_v36 = vsub.f32 %v4966_v11, %v1808_v2  ;;  %v1881_v8 = vand.u32 4294901760, %v1880_v48 }
 0x428   :  { %v5092_v58 = vpop.permute.xlu1 %925  ;;  %v5099_v34 = vsub.f32 %v5024_v21, %v6044_v23  ;;  %v5116_v23 = vand.u32 4294901760, %v5105_v61  ;;  %v5118_v62 = vand.u32 4294901760, %v1171_v56  ;;  %v5120_v30 = vand.u32 4294901760, %v1801_v9 }
 0x429   :  { %v6045_v14 = vand.u32 4294901760, %v5026_v46  ;;  %v1262_v59 = vand.u32 4294901760, %v1261_v44  ;;  %v6046_v2 = vand.u32 4294901760, %v5053_v42  ;;  %v1892_v53 = vand.u32 4294901760, %v1891_v63 }
 0x42a   :  { %v951_v10 = vpop.permute.xlu0 %950  ;;  %1815 = vmatprep.subr.mxu1 %v5116_v23  ;;  %v6047_v48 = vand.u32 4294901760, %v5032_v0  ;;  %v6048_v3 = vand.u32 4294901760, %v5000_v4  ;;  %1187 = vmatpush1.msra.mxu0 %v5118_v62  ;;  %v6049_v44 = vand.u32 4294901760, %v5051_v37  ;;  %v1903_v17 = vand.u32 4294901760, %v5099_v34 }
 0x42b   :  { %v1283_v29 = vsub.f32 %v5026_v46, %v6045_v14  ;;  %v1289_v11 = vsub.f32 %v5053_v42, %v6046_v2  ;;  %1817 = vmatpush1.msra.mxu1 %v5120_v30  ;;  %v5975_v2 = vand.u32 4294901760, %v5101_v22  ;;  %1252 = vmatmul.mubr.f32.vlgmr.msra.gmra.mrb[0].mxu0 %v1251_v15  ;;  %v976_v34 = vsel %vm4129_vm4, %v891_v13, %v951_v10 }
 0x42c   :  { %v1272_v12 = vsub.f32 %v5032_v0, %v6047_v48  ;;  %v5136_v21 = vsub.f32 %v5000_v4, %v6048_v3  ;;  %v1913_v14 = vsub.f32 %v5051_v37, %v6049_v44  ;;  %v5144_v63 = vpop.permute.xlu1 %940  ;;  %1882 = vmatmul.mubr.f32.vlgmr.msra.gmra.mrb[0].mxu1 %v1881_v8  ;;  %v6050_v48 = vand.u32 4294901760, %v5090_v5 }
 0x42d   :  { %v975_v3 = vsel %vm4125_vm3, %v891_v13, %v951_v10  ;;  %v1300_v0 = vand.u32 4294901760, %v5110_v33  ;;  %v1284_v44 = vand.u32 4294901760, %v1283_v29  ;;  %v1925_v18 = vsub.f32 %v5101_v22, %v5975_v2 }
 0x42e   :  { %v1295_v4 = vsub.f32 %v5090_v5, %v6050_v48  ;;  %v999_v15 = vmul.f32 %v975_v3, %v4604_v16  ;;  %v6051_v8 = vmov 0.0   ;;  %v1000_v32 = vmul.f32 %v976_v34, %v4607_v6 }
 0x42f   :  { %1257 = vmatprep.mubr.f32.mxu0 %v6051_v8  ;;  %v1290_v31 = vand.u32 4294901760, %v1289_v11  ;;  %v1301_v54 = vsub.f32 %v5110_v33, %v1300_v0  ;;  %1887 = vmatprep.mubr.f32.mxu1 %v6051_v8  ;;  %v1914_v29 = vand.u32 4294901760, %v1913_v14  ;;  %v1926_v25 = vand.u32 4294901760, %v1925_v18 }
 0x430   :  { %v1296_v48 = vand.u32 4294901760, %v1295_v4  ;;  %v5167_v2 = vadd.f32 %v4913_v24, %v999_v15  ;;  %v1930_v10 = vand.u32 4294901760, %v5136_v21  ;;  %v5171_v13 = vadd.f32 %v4913_v24, %v1000_v32  ;;  %1263 = vmatmul.mubr.f32.gmra.mrb[2].mxu0 %v1262_v59  ;;  %1893 = vmatmul.mubr.f32.gmra.mrb[2].mxu1 %v1892_v53  ;;  %v876_v14 = vpop.permute.xlu1 %875 }
 0x431   :  { %v1302_v4 = vand.u32 4294901760, %v1301_v54  ;;  %v6052_v6 = vand.u32 4294901760, %v5113_v36  ;;  %v3761_v3 = vpack.c.bf16 %v1926_v25, %v1914_v29  ;;  %1268 = vmatprep.mubr.f32.mxu0 %v6051_v8  ;;  %1898 = vmatprep.mubr.f32.mxu1 %v6051_v8  ;;  %v5186_v25 = vsub.f32 %v1171_v56, %v5118_v62 }
 0x432   :  { %v3737_v16 = vpack.c.bf16 %v1296_v48, %v1284_v44  ;;  %v1074_v18 = vmul.f32 %v4984_v55, %v5167_v2  ;;  %v1273_v44 = vand.u32 4294901760, %v1272_v12  ;;  %v1075_v32 = vmul.f32 %v4984_v55, %v5171_v13 }
 0x433   :  { %v1919_v11 = vsub.f32 %v5113_v36, %v6052_v6  ;;  %v3739_v54 = vpack.c.bf16 %v1302_v4, %v1290_v31  ;;  %v1931_v59 = vsub.f32 %v5136_v21, %v1930_v10  ;;  %v5189_v53 = vsub.f32 %v1801_v9, %v5120_v30  ;;  %3762 = vmatprep.subr.bf16.mxu1 %v3761_v3 }
 0x434   :  { %3738 = vmatprep.subr.bf16.mxu0 %v3737_v16  ;;  %vm1098_vm13 = vcmp.ge.f32.partialorder %v1074_v18, 0.0  ;;  %v5193_v12 = vsub.f32 %v5061_v52, %v5082_v51  ;;  %vm1099_vm14 = vcmp.ge.f32.partialorder %v1075_v32, 0.0  ;;  %1904 = vmatmul.mubr.f32.gmra.mrb[4].mxu1 %v1903_v17  ;;  %v5205_v52 = vsub.f32 %v5105_v61, %v5116_v23  ;;  %v936_v4 = vpop.permute.xlu1 %935 }
 0x435   :  { %v5196_v34 = vsel %vm1098_vm13, %v5167_v2, 0.0  ;;  %3740 = vmatpush1.bf16.msra.mxu0 %v3739_v54  ;;  %v1920_v31 = vand.u32 4294901760, %v1919_v11  ;;  %v1932_v15 = vand.u32 4294901760, %v1931_v59  ;;  %v5199_v56 = vsel %vm1099_vm14, %v5171_v13, 0.0  ;;  %2004 = vmatprep.mubr.f32.mxu1 %v6051_v8 }
 0x436   :  { %6053 = vst [vmem:[#allocation37_spill] sm:$0xff] %v5199_v56  ;;  %v5979_v9 = vand.u32 4294901760, %v5193_v12  ;;  %1274 = vmatmul.mubr.f32.gmra.mrb[4].mxu0 %v1273_v44  ;;  %v5977_v17 = vand.u32 4294901760, %v5186_v25  ;;  %v5976_v16 = vand.u32 4294901760, %v5189_v53  ;;  %v5978_v6 = vand.u32 4294901760, %v5205_v52 }
 0x437   :  { %v3763_v48 = vpack.c.bf16 %v1932_v15, %v1920_v31  ;;  %1374 = vmatprep.mubr.f32.mxu0 %v6051_v8  ;;  %v969_v44 = vsel %vm4125_vm3, %v876_v14, %v936_v4  ;;  %v970_v32 = vsel %vm4129_vm4, %v876_v14, %v936_v4  ;;  %v3741_v31 = vpack.c.bf16 %v5090_v5, %v5026_v46 }
 0x438   :  { %v1307_v29 = vsub.f32 %v5193_v12, %v5979_v9  ;;  %v1313_v61 = vsub.f32 %v5186_v25, %v5977_v17  ;;  %v1943_v3 = vsub.f32 %v5189_v53, %v5976_v16  ;;  %v1937_v18 = vsub.f32 %v5205_v52, %v5978_v6  ;;  %v6080_v17 = vld [vmem:[#allocation31_spill] sm:$0xff] }
 0x439   :  { %3764 = vmatpush1.bf16.msra.mxu1 %v3763_v48  ;;  %v993_v15 = vmul.f32 %v969_v44, %v4614_v1  ;;  %v994_v48 = vmul.f32 %v970_v32, %v4617_v19  ;;  %v3765_v16 = vpack.c.bf16 %v5101_v22, %v5051_v37  ;;  %v3743_v14 = vpack.c.bf16 %v5110_v33, %v5053_v42  ;;  %v6057_v32 = vld [vmem:[#allocation11_spill] sm:$0xff] }
 0x43a   :  { %v1308_v11 = vand.u32 4294901760, %v1307_v29  ;;  %v1314_v54 = vand.u32 4294901760, %v1313_v61  ;;  %v1938_v59 = vand.u32 4294901760, %v1937_v18  ;;  %v1944_v29 = vand.u32 4294901760, %v1943_v3  ;;  %v6055_v3 = vld [vmem:[#allocation24_spill] sm:$0xff] }
 0x43b   :  { %v5234_v39 = vadd.f32 %v4913_v24, %v993_v15  ;;  %v5237_v40 = vadd.f32 %v4913_v24, %v994_v48  ;;  %v3767_v4 = vpack.c.bf16 %v5136_v21, %v5113_v36  ;;  %v968_v61 = vsel %vm4155_vm6, %v5015_v60, %v5009_v35  ;;  %v6059_v15 = vld [vmem:[#allocation15_spill] sm:$0xff]  ;;  %v6060_v48 = vld [vmem:[#allocation9_spill] sm:$0xff] }
 0x43c   :  { %1309 = vmatprep.subr.mxu0 %v1308_v11  ;;  %1939 = vmatprep.subr.mxu1 %v1938_v59  ;;  %v972_v11 = vsel %vm4121_vm2, %v5056_v49, %v5144_v63  ;;  %v974_v18 = vsel %vm4155_vm6, %v6055_v3, %v5036_v28  ;;  %v6058_v59 = vld [vmem:[#allocation5_spill] sm:$0xff]  ;;  %v6086_v21 = vand.u32 4294901760, %v5193_v12 }
 0x43d   :  { %1315 = vmatpush1.msra.mxu0 %v1314_v54  ;;  %1945 = vmatpush1.msra.mxu1 %v1944_v29  ;;  %v1068_v1 = vmul.f32 %v4984_v55, %v5234_v39  ;;  %v1069_v19 = vmul.f32 %v4984_v55, %v5237_v40  ;;  %v966_v55 = vsel %vm4121_vm2, %v4959_v41, %v5092_v58 }
 0x43e   :  { %3742 = vmatprep.subr.bf16.mxu0 %v3741_v31  ;;  %1376 = vmatmul.mubr.f32.vlgmr.msra.gmra.mrb[0].mxu0 %v4849_v7  ;;  %v990_v44 = vmul.f32 %v966_v55, %v6056_v38  ;;  %v996_v54 = vmul.f32 %v972_v11, %v6057_v32  ;;  %v992_v31 = vmul.f32 %v968_v61, %v6058_v59  ;;  %v6065_v38 = vld [vmem:[#allocation32_spill] sm:$0xff]  ;;  %v6071_v59 = vld [vmem:[#allocation6_spill] sm:$0xff] }
 0x43f   :  { %3766 = vmatprep.subr.bf16.mxu1 %v3765_v16  ;;  %3744 = vmatpush1.bf16.msra.mxu0 %v3743_v14  ;;  %vm1092_vm3 = vcmp.ge.f32.partialorder %v1068_v1, 0.0  ;;  %vm1093_vm4 = vcmp.ge.f32.partialorder %v1069_v19, 0.0  ;;  %v998_v29 = vmul.f32 %v974_v18, %v6060_v48  ;;  %v6061_v14 = vld [vmem:[#allocation30_spill] sm:$0xff]  ;;  %v6062_v1 = vld [vmem:[#allocation16_spill] sm:$0xff]  ;;  %v965_v19 = vsel %vm4117_vm1, %v4959_v41, %v5092_v58 }
 0x440   :  { %2006 = vmatmul.mubr.f32.vlgmr.msra.gmra.mrb[0].mxu1 %v4865_v27  ;;  %1410 = vmatprep.subr.mxu0 %v5193_v12  ;;  %v5252_v24 = vsel %vm1092_vm3, %v5234_v39, 0.0  ;;  %v5255_v16 = vsel %vm1093_vm4, %v5237_v40, 0.0  ;;  %v967_v61 = vsel %vm4151_vm5, %v5015_v60, %v5009_v35  ;;  %v971_v18 = vsel %vm4117_vm1, %v5056_v49, %v5144_v63  ;;  %v6067_v41 = vld [vmem:[#allocation12_spill] sm:$0xff]  ;;  %v6068_v35 = vld [vmem:[#allocation17_spill] sm:$0xff]  ;;  %v6072_v48 = vld [vmem:[#allocation18_spill] sm:$0xff] }
 0x441   :  { %3768 = vmatpush1.bf16.msra.mxu1 %v3767_v4  ;;  %1381 = vmatprep.mubr.f32.mxu0 %v6051_v8  ;;  %6054 = vst [vmem:[#allocation38_spill] sm:$0xff] %v5255_v16  ;;  %v6064_v4 = vld [vmem:[#allocation13_spill] sm:$0xff]  ;;  %v5317_v58 = vadd.f32 %v6067_v41, %v992_v31  ;;  %v973_v60 = vsel %vm4151_vm5, %v6055_v3, %v5036_v28  ;;  %v6069_v49 = vand.u32 4294901760, %v5026_v46  ;;  %v6070_v63 = vand.u32 4294901760, %v5090_v5  ;;  %v1154_v46 = vld [vmem:[%s5920_s4 + $0x30] sm:$0xff]  ;;  %v6075_v5 = vld [vmem:[#allocation14_spill] sm:$0xff] }
 0x442   :  { %2040 = vmatprep.subr.mxu1 %v5205_v52  ;;  %2011 = vmatprep.mubr.f32.mxu1 %v6051_v8  ;;  %v5299_v55 = vadd.f32 %v6064_v4, %v990_v44  ;;  %v5312_v32 = vadd.f32 %v6064_v4, %v996_v54  ;;  %v5330_v54 = vadd.f32 %v6067_v41, %v998_v29  ;;  %v6073_v28 = vand.u32 4294901760, %v5051_v37  ;;  %v6076_v29 = vld [vmem:[#allocation10_spill] sm:$0xff] }
 0x443   :  { %1383 = vmatmul.mubr.f32.gmra.mrb[2].mxu0 %v4877_v47  ;;  %v3749_v44 = vpack.c.bf16 %v6070_v63, %v6069_v49  ;;  %v989_v31 = vmul.f32 %v965_v19, %v6071_v59  ;;  %v6074_v3 = vand.u32 4294901760, %v5101_v22  ;;  %v995_v49 = vmul.f32 %v971_v18, %v6076_v29  ;;  %v6077_v19 = vld [vmem:[#allocation4_spill] sm:$0xff]  ;;  %v6078_v22 = vld [vmem:[#allocation23_spill] sm:$0xff] }
 0x444   :  { %1413 = vmatpush1.msra.mxu0 %v5186_v25  ;;  %2013 = vmatmul.mubr.f32.gmra.mrb[2].mxu1 %v4879_v43  ;;  %v1065_v11 = vmul.f32 %v6075_v5, %v5299_v55  ;;  %v991_v63 = vmul.f32 %v967_v61, %v6077_v19  ;;  %v1071_v37 = vmul.f32 %v6075_v5, %v5312_v32  ;;  %v2422_v18 = vsel %vm1160_vm7, %v1154_v46, 0 }
 0x445   :  { %2043 = vmatpush1.msra.mxu1 %v5189_v53  ;;  %3746 = vmatprep.subr.bf16.mxu0 %v5017_v20  ;;  %v3773_v50 = vpack.c.bf16 %v6074_v3, %v6073_v28  ;;  %v1067_v59 = vmul.f32 %v6078_v22, %v5317_v58  ;;  %v6079_v28 = vld [vmem:[#allocation8_spill] sm:$0xff]  ;;  %v1073_v61 = vmul.f32 %v6078_v22, %v5330_v54 }
 0x446   :  { %3770 = vmatprep.subr.bf16.mxu1 %v5019_v57  ;;  %1388 = vmatprep.mubr.f32.mxu0 %v6051_v8  ;;  %v997_v3 = vmul.f32 %v973_v60, %v6079_v28  ;;  %v1157_v60 = vld [vmem:[%s5920_s4 + $0x48] sm:$0xff]  ;;  %vm1089_vm1 = vcmp.ge.f32.partialorder %v1065_v11, 0.0  ;;  %v5367_v29 = vadd.f32 %v6064_v4, %v995_v49  ;;  %v5371_v46 = vadd.f32 %v6067_v41, %v991_v63 }
 0x447   :  { %2018 = vmatprep.mubr.f32.mxu1 %v6051_v8  ;;  %1390 = vmatmul.mubr.f32.gmra.mrb[4].mxu0 %v4946_v45  ;;  %vm1095_vm2 = vcmp.ge.f32.partialorder %v1071_v37, 0.0  ;;  %v5377_v28 = vand.u32 4294901760, %v2422_v18  ;;  %vm1091_vm5 = vcmp.ge.f32.partialorder %v1067_v59, 0.0  ;;  %v6084_v49 = vand.u32 4294901760, %v5113_v36 }
 0x448   :  { %2020 = vmatmul.mubr.f32.gmra.mrb[4].mxu1 %v4949_v26  ;;  %1472 = vmatprep.mubr.f32.mxu0 %v6051_v8  ;;  %v5380_v6 = vadd.f32 %v6067_v41, %v997_v3  ;;  %v3052_v9 = vsel %vm1160_vm7, %v1157_v60, 0  ;;  %vm1097_vm6 = vcmp.ge.f32.partialorder %v1073_v61, 0.0  ;;  %v5395_v33 = vsel %vm1089_vm1, %v5299_v55, 0.0 }
 0x449   :  { %2102 = vmatprep.mubr.f32.mxu1 %v6051_v8  ;;  %v3775_v63 = vpack.c.bf16 %v1930_v10, %v6084_v49  ;;  %v1070_v36 = vmul.f32 %v6075_v5, %v5367_v29  ;;  %v5403_v10 = vsel %vm1095_vm2, %v5312_v32, 0.0  ;;  %v6087_v41 = vand.u32 4294901760, %v5205_v52 }
 0x44a   :  { %v5415_v12 = vsel %vm1091_vm5, %v5317_v58, 0.0  ;;  %v5420_v11 = vand.u32 4294901760, %v3052_v9  ;;  %v1072_v37 = vmul.f32 %v6078_v22, %v5380_v6  ;;  %v6088_v3 = vand.u32 4294901760, %v6068_v35 }
 0x44b   :  { %1475 = vmatmul.mubr.f32.vlgmr.msra.gmra.mrb[0].mxu0 %v6059_v15  ;;  %v1137_v52 = vsub.f32 %v5299_v55, %v5395_v33  ;;  %v5431_v59 = vsel %vm1097_vm6, %v5330_v54, 0.0  ;;  %v6090_v60 = vand.u32 4294901760, %v6072_v48  ;;  %vm1094_vm9 = vcmp.ge.f32.partialorder %v1070_v36, 0.0 }
 0x44c   :  { %3748 = vmatpush1.bf16.msra.mxu0 %v6061_v14  ;;  %2105 = vmatmul.mubr.f32.vlgmr.msra.gmra.mrb[0].mxu1 %v6062_v1  ;;  %v6091_v55 = vand.u32 4294901760, %v5189_v53  ;;  %v1139_v61 = vsub.f32 %v5317_v58, %v5415_v12  ;;  %vm1096_vm10 = vcmp.ge.f32.partialorder %v1072_v37, 0.0 }
 0x44d   :  { %3772 = vmatpush1.bf16.msra.mxu1 %v6065_v38  ;;  %1506 = vmatprep.subr.mxu0 %v5082_v51  ;;  %v2436_v58 = vand.u32 4294901760, %v1137_v52 }
 0x44e   :  { %2136 = vmatprep.subr.mxu1 %v5116_v23  ;;  %1480 = vmatprep.mubr.f32.mxu0 %v6051_v8 }
 0x44f   :  { %2110 = vmatprep.mubr.f32.mxu1 %v6051_v8  ;;  %1483 = vmatmul.mubr.f32.gmra.mrb[2].mxu0 %v6068_v35 }
 0x450   :  { %1508 = vmatpush1.msra.mxu0 %v5118_v62  ;;  %2113 = vmatmul.mubr.f32.gmra.mrb[2].mxu1 %v6072_v48  ;;  %v5453_v48 = vsub.f32 %v3052_v9, %v5420_v11  ;;  %v5469_v9 = vsel %vm1094_vm9, %v5367_v29, 0.0 }
 0x451   :  { %2138 = vmatpush1.msra.mxu1 %v5120_v30  ;;  %3750 = vmatprep.subr.bf16.mxu0 %v3749_v44  ;;  %v5359_v44 = vadd.f32 %v6064_v4, %v989_v31  ;;  %v6082_v31 = vand.u32 4294901760, %v5053_v42  ;;  %v6083_v4 = vand.u32 4294901760, %v6059_v15  ;;  %v1155_v15 = vld [vmem:[%s5920_s4 + $0x38] sm:$0xff]  ;;  %v5491_v36 = vsub.f32 %v5367_v29, %v5469_v9 }
 0x452   :  { %3774 = vmatprep.subr.bf16.mxu1 %v3773_v50  ;;  %1488 = vmatprep.mubr.f32.mxu0 %v6051_v8  ;;  %v6081_v50 = vld [vmem:[#allocation29_spill] sm:$0xff]  ;;  %v2425_v35 = vsel %vm1160_vm7, %v1155_v15, 0 }
 0x453   :  { %2118 = vmatprep.mubr.f32.mxu1 %v6051_v8  ;;  %1491 = vmatmul.mubr.f32.gmra.mrb[4].mxu0 %v6080_v17  ;;  %v3751_v19 = vpack.c.bf16 %v1300_v0, %v6082_v31  ;;  %v1064_v42 = vmul.f32 %v6075_v5, %v5359_v44  ;;  %v6085_v0 = vand.u32 4294901760, %v6062_v1  ;;  %v1066_v1 = vmul.f32 %v6078_v22, %v5371_v46 }
 0x454   :  { %2121 = vmatmul.mubr.f32.gmra.mrb[4].mxu1 %v6081_v50  ;;  %1567 = vmatprep.mubr.f32.mxu0 %v6051_v8  ;;  %v5418_v5 = vsub.f32 %v2422_v18, %v5377_v28  ;;  %v6089_v18 = vand.u32 4294901760, %v5186_v25  ;;  %v5439_v22 = vsub.f32 %v5312_v32, %v5403_v10  ;;  %v1145_v25 = vsub.f32 %v5330_v54, %v5431_v59 }
 0x455   :  { %2197 = vmatprep.mubr.f32.mxu1 %v6051_v8  ;;  %vm1088_vm15 = vcmp.ge.f32.partialorder %v1064_v42, 0.0  ;;  %vm1090_vm8 = vcmp.ge.f32.partialorder %v1066_v1, 0.0  ;;  %v5465_v54 = vand.u32 4294901760, %v2425_v35  ;;  %v6093_v31 = vand.u32 4294901760, %v6081_v50 }
 0x456   :  { %v5981_v32 = vand.u32 4294901760, %v5418_v5  ;;  %v5460_v53 = vsel %vm1088_vm15, %v5359_v44, 0.0  ;;  %v3070_v42 = vand.u32 4294901760, %v1145_v25 }
 0x457   :  { %1571 = vmatmul.mubr.f32.vlgmr.msra.gmra.mrb[0].mxu0 %v6083_v4  ;;  %v5477_v4 = vsel %vm1090_vm8, %v5371_v46, 0.0  ;;  %v5486_v50 = vsub.f32 %v5359_v44, %v5460_v53  ;;  %v5502_v1 = vsub.f32 %v2425_v35, %v5465_v54 }
 0x458   :  { %3752 = vmatpush1.bf16.msra.mxu0 %v3751_v19  ;;  %2201 = vmatmul.mubr.f32.vlgmr.msra.gmra.mrb[0].mxu1 %v6085_v0  ;;  %v3066_v19 = vand.u32 4294901760, %v5439_v22  ;;  %v5980_v0 = vand.u32 4294901760, %v5453_v48  ;;  %v5499_v15 = vsub.f32 %v5418_v5, %v5981_v32  ;;  %v1138_v44 = vsub.f32 %v5371_v46, %v5477_v4 }
 0x459   :  { %3776 = vmatpush1.bf16.msra.mxu1 %v3775_v63  ;;  %1614 = vmatprep.subr.mxu0 %v6086_v21  ;;  %v5482_v63 = vsel %vm1096_vm10, %v5380_v6, 0.0  ;;  %v5494_v21 = vsub.f32 %v1137_v52, %v2436_v58  ;;  %v5527_v52 = vsub.f32 %v1145_v25, %v3070_v42 }
 0x45a   :  { %2244 = vmatprep.subr.mxu1 %v6087_v41  ;;  %1576 = vmatprep.mubr.f32.mxu0 %v6051_v8  ;;  %v1141_v41 = vsub.f32 %v5237_v40, %v5255_v16  ;;  %v5511_v29 = vsub.f32 %v5439_v22, %v3066_v19  ;;  %v1144_v37 = vsub.f32 %v5380_v6, %v5482_v63  ;;  %v2438_v6 = vand.u32 4294901760, %v5486_v50 }
 0x45b   :  { %2206 = vmatprep.mubr.f32.mxu1 %v6051_v8  ;;  %1580 = vmatmul.mubr.f32.gmra.mrb[2].mxu0 %v6088_v3  ;;  %v1147_v3 = vsub.f32 %v5171_v13, %v5199_v56  ;;  %v5533_v13 = vsub.f32 %v5453_v48, %v5980_v0  ;;  %v2442_v22 = vand.u32 4294901760, %v1138_v44 }
 0x45c   :  { %1618 = vmatpush1.msra.mxu0 %v6089_v18  ;;  %2210 = vmatmul.mubr.f32.gmra.mrb[2].mxu1 %v6090_v60  ;;  %v1156_v18 = vld [vmem:[%s5920_s4 + $0x40] sm:$0x1]  ;;  %v1159_v60 = vld [vmem:[%s5920_s4 + $0x58] sm:$0x1]  ;;  %v2434_v35 = vsel %vm116_vm0, %v1141_v41, 0 }
 0x45d   :  { %2248 = vmatpush1.msra.mxu1 %v6091_v55  ;;  %3754 = vmatprep.subr.bf16.mxu0 %v5017_v20  ;;  %v1158_v20 = vld [vmem:[%s5920_s4 + $0x50] sm:$0xff]  ;;  %v5982_v55 = vand.u32 4294901760, %v5511_v29  ;;  %v3064_v25 = vsel %vm116_vm0, %v1147_v3, 0 }
 0x45e   :  { %3778 = vmatprep.subr.bf16.mxu1 %v5019_v57  ;;  %1585 = vmatprep.mubr.f32.mxu0 %v6051_v8  ;;  %v6092_v57 = vand.u32 4294901760, %v6080_v17  ;;  %v2440_v17 = vand.u32 4294901760, %v1139_v61  ;;  %v3055_v49 = vsel %vm1160_vm7, %v1158_v20, 0  ;;  %v5585_v41 = vand.u32 4294901760, %v3064_v25 }
 0x45f   :  { %2215 = vmatprep.mubr.f32.mxu1 %v6051_v8  ;;  %v5521_v40 = vand.u32 4294901760, %v3055_v49 }
 0x460   :  { %1589 = vmatmul.mubr.f32.gmra.mrb[4].mxu0 %v6092_v57  ;;  %2219 = vmatmul.mubr.f32.gmra.mrb[4].mxu1 %v6093_v31  ;;  %v5519_v46 = vsub.f32 %v1139_v61, %v2440_v17  ;;  %v3072_v61 = vand.u32 4294901760, %v1144_v37  ;;  %v5565_v57 = vsub.f32 %v5486_v50, %v2438_v6  ;;  %v3058_v31 = vsel %vm1160_vm7, %v1159_v60, 0 }
 0x461   :  { %1677 = vmatprep.mubr.f32.mxu0 %v6051_v8  ;;  %2307 = vmatprep.mubr.f32.mxu1 %v6051_v8 }
 0x462   :  { %v5983_v20 = vand.u32 4294901760, %v5519_v46 }
 0x464   :  { %1679 = vmatmul.mubr.f32.vlgmr.msra.gmra.mrb[0].mxu0 %v4849_v7  ;;  %2309 = vmatmul.mubr.f32.vlgmr.msra.gmra.mrb[0].mxu1 %v4865_v27  ;;  %v2555_v60 = vsub.f32 %v5519_v46, %v5983_v20 }
 0x465   :  { %3756 = vmatpush1.bf16.msra.mxu0 %v6061_v14  ;;  %3780 = vmatpush1.bf16.msra.mxu1 %v6065_v38  ;;  %v1146_v14 = vsub.f32 %v5167_v2, %v5196_v34  ;;  %v5539_v2 = vpack.c.bf16 %v2440_v17, %v2436_v58  ;;  %v5985_v38 = vand.u32 4294901760, %v5494_v21  ;;  %v5984_v58 = vand.u32 4294901760, %v5527_v52 }
 0x466   :  { %1708 = vmatprep.subr.mxu0 %v5082_v51  ;;  %2338 = vmatprep.subr.mxu1 %v5116_v23  ;;  %v1140_v51 = vsub.f32 %v5234_v39, %v5252_v24  ;;  %v3068_v23 = vand.u32 4294901760, %v5491_v36  ;;  %v5551_v39 = vpack.c.bf16 %v3070_v42, %v3066_v19  ;;  %v5575_v17 = vand.u32 4294901760, %v2434_v35 }
 0x467   :  { %1684 = vmatprep.mubr.f32.mxu0 %v6051_v8  ;;  %2314 = vmatprep.mubr.f32.mxu1 %v6051_v8  ;;  %v2543_v50 = vsub.f32 %v5494_v21, %v5985_v38  ;;  %v5583_v42 = vsub.f32 %v1138_v44, %v2442_v22  ;;  %v3061_v3 = vsel %vm116_vm0, %v1146_v14, 0  ;;  %v3185_v14 = vsub.f32 %v5527_v52, %v5984_v58 }
 0x468   :  { %1686 = vmatmul.mubr.f32.gmra.mrb[2].mxu0 %v4877_v47  ;;  %2316 = vmatmul.mubr.f32.gmra.mrb[2].mxu1 %v4879_v43  ;;  %v5573_v19 = vsub.f32 %v5491_v36, %v3068_v23  ;;  %v3173_v36 = vsub.f32 %v5511_v29, %v5982_v55  ;;  %v5601_v0 = vpack.c.bf16 %v3072_v61, %v3068_v23  ;;  %v5986_v55 = vand.u32 4294901760, %v5565_v57 }
 0x469   :  { %1710 = vmatpush1.msra.mxu0 %v5118_v62  ;;  %2340 = vmatpush1.msra.mxu1 %v5120_v30  ;;  %v5560_v62 = vsub.f32 %v3055_v49, %v5521_v40  ;;  %v2428_v30 = vsel %vm1160_vm7, %v1156_v18, 0  ;;  %v2431_v49 = vsel %vm116_vm0, %v1140_v51, 0  ;;  %v5592_v51 = vpack.c.bf16 %v2442_v22, %v2438_v6 }
 0x46a   :  { %3782 = vmatprep.subr.bf16.mxu0 %v5539_v2  ;;  %3806 = vmatprep.subr.bf16.mxu1 %v5551_v39  ;;  %v5594_v18 = vsub.f32 %v1144_v37, %v3072_v61  ;;  %v5599_v44 = vand.u32 4294901760, %v2428_v30  ;;  %v5603_v32 = vand.u32 4294901760, %v2431_v49  ;;  %v5610_v37 = vand.u32 4294901760, %v3061_v3 }
 0x46b   :  { %1691 = vmatprep.mubr.f32.mxu0 %v6051_v8  ;;  %2321 = vmatprep.mubr.f32.mxu1 %v6051_v8  ;;  %v2544_v6 = vand.u32 4294901760, %v2543_v50  ;;  %v5987_v22 = vand.u32 4294901760, %v5573_v19  ;;  %v5614_v20 = vsub.f32 %v2434_v35, %v5575_v17  ;;  %v3174_v23 = vand.u32 4294901760, %v3173_v36 }
 0x46c   :  { %1693 = vmatmul.mubr.f32.gmra.mrb[4].mxu0 %v4946_v45  ;;  %2323 = vmatmul.mubr.f32.gmra.mrb[4].mxu1 %v4949_v26  ;;  %v5620_v58 = vsub.f32 %v3064_v25, %v5585_v41  ;;  %v5622_v38 = vand.u32 4294901760, %v3058_v31  ;;  %v5632_v25 = vsub.f32 %v2431_v49, %v5603_v32  ;;  %v3186_v36 = vand.u32 4294901760, %v3185_v14 }
 0x46d   :  { %1769 = vmatprep.mubr.f32.mxu0 %v6051_v8  ;;  %2399 = vmatprep.mubr.f32.mxu1 %v6051_v8  ;;  %v2549_v61 = vsub.f32 %v5565_v57, %v5986_v55  ;;  %v3179_v49 = vsub.f32 %v5573_v19, %v5987_v22  ;;  %v5988_v14 = vand.u32 4294901760, %v5614_v20  ;;  %v6094_v55 = vand.u32 4294901760, %v5583_v42 }
 0x46e   :  { %v2572_v22 = vand.u32 4294901760, %v5632_v25 }
 0x46f   :  { %v2561_v35 = vsub.f32 %v5583_v42, %v6094_v55  ;;  %v3141_v55 = vand.u32 4294901760, %v5533_v13 }
 0x470   :  { %1771 = vmatmul.mubr.f32.vlgmr.msra.gmra.mrb[0].mxu0 %v4849_v7  ;;  %2401 = vmatmul.mubr.f32.vlgmr.msra.gmra.mrb[0].mxu1 %v4865_v27  ;;  %v2556_v7 = vand.u32 4294901760, %v2555_v60  ;;  %v5638_v60 = vsub.f32 %v2428_v30, %v5599_v44  ;;  %v5643_v27 = vsub.f32 %v3061_v3, %v5610_v37  ;;  %v3809_v30 = vpack.c.bf16 %v3186_v36, %v3174_v23 }
 0x471   :  { %3784 = vmatpush1.bf16.msra.mxu0 %v5592_v51  ;;  %3808 = vmatpush1.bf16.msra.mxu1 %v5601_v0  ;;  %v5656_v3 = vsub.f32 %v3058_v31, %v5622_v38  ;;  %v2550_v23 = vand.u32 4294901760, %v2549_v61  ;;  %v6096_v36 = vand.u32 4294901760, %v5502_v1  ;;  %v2562_v13 = vand.u32 4294901760, %v2561_v35 }
 0x472   :  { %2445 = vmatprep.subr.mxu0 %v5575_v17  ;;  %3075 = vmatprep.subr.mxu1 %v5585_v41  ;;  %v3785_v50 = vpack.c.bf16 %v2556_v7, %v2544_v6  ;;  %v2511_v6 = vand.u32 4294901760, %v5499_v15  ;;  %v6095_v7 = vand.u32 4294901760, %v5594_v18  ;;  %v3180_v15 = vand.u32 4294901760, %v3179_v49 }
 0x473   :  { %1776 = vmatprep.mubr.f32.mxu0 %v6051_v8  ;;  %2406 = vmatprep.mubr.f32.mxu1 %v6051_v8  ;;  %v2521_v31 = vsub.f32 %v5502_v1, %v6096_v36 }
 0x474   :  { %1778 = vmatmul.mubr.f32.gmra.mrb[2].mxu0 %v4877_v47  ;;  %2408 = vmatmul.mubr.f32.gmra.mrb[2].mxu1 %v4879_v43  ;;  %v5990_v47 = vand.u32 4294901760, %v5620_v58  ;;  %v3191_v43 = vsub.f32 %v5594_v18, %v6095_v7 }
 0x475   :  { %2447 = vmatpush1.msra.mxu0 %v5603_v32  ;;  %3077 = vmatpush1.msra.mxu1 %v5610_v37  ;;  %v2522_v61 = vand.u32 4294901760, %v2521_v31  ;;  %v6100_v31 = vand.u32 4294901760, %v5656_v3 }
 0x476   :  { %3786 = vmatprep.subr.bf16.mxu0 %v3785_v50  ;;  %3810 = vmatprep.subr.bf16.mxu1 %v3809_v30  ;;  %v2567_v50 = vsub.f32 %v5614_v20, %v5988_v14  ;;  %v3197_v7 = vsub.f32 %v5620_v58, %v5990_v47  ;;  %v3192_v14 = vand.u32 4294901760, %v3191_v43  ;;  %v3787_v30 = vpack.c.bf16 %v2562_v13, %v2550_v23 }
 0x477   :  { %1783 = vmatprep.mubr.f32.mxu0 %v6051_v8  ;;  %2413 = vmatprep.mubr.f32.mxu1 %v6051_v8  ;;  %v6098_v47 = vand.u32 4294901760, %v5643_v27  ;;  %v3162_v13 = vsub.f32 %v5656_v3, %v6100_v31  ;;  %v6111_v31 = vand.u32 4294901760, %v5614_v20 }
 0x478   :  { %1785 = vmatmul.mubr.f32.gmra.mrb[4].mxu0 %v4946_v45  ;;  %2415 = vmatmul.mubr.f32.gmra.mrb[4].mxu1 %v4949_v26  ;;  %v6097_v45 = vand.u32 4294901760, %v5560_v62  ;;  %v2573_v26 = vsub.f32 %v5632_v25, %v2572_v22  ;;  %v3811_v35 = vpack.c.bf16 %v3192_v14, %v3180_v15  ;;  %v2568_v56 = vand.u32 4294901760, %v2567_v50 }
 0x479   :  { %2506 = vmatprep.mubr.f32.mxu0 %v6051_v8  ;;  %3136 = vmatprep.mubr.f32.mxu1 %v6051_v8  ;;  %v3203_v16 = vsub.f32 %v5643_v27, %v6098_v47  ;;  %v3198_v43 = vand.u32 4294901760, %v3197_v7  ;;  %v3813_v15 = vpack.c.bf16 %v5527_v52, %v5511_v29  ;;  %v3163_v50 = vand.u32 4294901760, %v3162_v13 }
 0x47a   :  { %v3151_v49 = vsub.f32 %v5560_v62, %v6097_v45  ;;  %v6099_v45 = vand.u32 4294901760, %v5638_v60  ;;  %v2574_v14 = vand.u32 4294901760, %v2573_v26 }
 0x47b   :  { %v3204_v47 = vand.u32 4294901760, %v3203_v16  ;;  %v3815_v16 = vpack.c.bf16 %v5594_v18, %v5573_v19 }
 0x47c   :  { %2512 = vmatmul.mubr.f32.vlgmr.msra.gmra.mrb[6].mxu0 %v2511_v6  ;;  %v2532_v36 = vsub.f32 %v5638_v60, %v6099_v45  ;;  %3142 = vmatmul.mubr.f32.vlgmr.msra.gmra.mrb[6].mxu1 %v3141_v55  ;;  %v3152_v23 = vand.u32 4294901760, %v3151_v49  ;;  %v3789_v6 = vpack.c.bf16 %v5519_v46, %v5494_v21  ;;  %v6103_v49 = vand.u32 4294901760, %v5511_v29 }
 0x47d   :  { %3788 = vmatpush1.bf16.msra.mxu0 %v3787_v30  ;;  %3812 = vmatpush1.bf16.msra.mxu1 %v3811_v35  ;;  %v6101_v30 = vand.u32 4294901760, %v5494_v21  ;;  %v6105_v21 = vand.u32 4294901760, %v5565_v57  ;;  %v6106_v29 = vand.u32 4294901760, %v5583_v42  ;;  %v6108_v35 = vand.u32 4294901760, %v5573_v19 }
 0x47e   :  { %2569 = vmatprep.subr.mxu0 %v2568_v56  ;;  %3199 = vmatprep.subr.mxu1 %v3198_v43  ;;  %v2533_v55 = vand.u32 4294901760, %v2532_v36  ;;  %v3791_v56 = vpack.c.bf16 %v5583_v42, %v5565_v57  ;;  %v6104_v36 = vand.u32 4294901760, %v5527_v52  ;;  %v6107_v52 = vand.u32 4294901760, %v5418_v5  ;;  %v6122_v42 = vld [vmem:[#allocation27_spill] sm:$0xff] }
 0x47f   :  { %2517 = vmatprep.mubr.f32.mxu0 %v6051_v8  ;;  %3147 = vmatprep.mubr.f32.mxu1 %v6051_v8  ;;  %v6109_v45 = vand.u32 4294901760, %v5594_v18  ;;  %v6112_v57 = vand.u32 4294901760, %v5620_v58  ;;  %v6115_v19 = vand.u32 4294901760, %v5643_v27 }
 0x480   :  { %2523 = vmatmul.mubr.f32.gmra.mrb[8].mxu0 %v2522_v61  ;;  %3153 = vmatmul.mubr.f32.gmra.mrb[8].mxu1 %v3152_v23  ;;  %v6102_v61 = vand.u32 4294901760, %v5519_v46  ;;  %v3821_v26 = vpack.c.bf16 %v6104_v36, %v6103_v49  ;;  %v3799_v46 = vpack.c.bf16 %v6106_v29, %v6105_v21  ;;  %v6110_v23 = vand.u32 4294901760, %v5453_v48 }
 0x481   :  { %2575 = vmatpush1.msra.mxu0 %v2574_v14  ;;  %3205 = vmatpush1.msra.mxu1 %v3204_v47  ;;  %v3823_v43 = vpack.c.bf16 %v6109_v45, %v6108_v35  ;;  %v6126_v14 = vld [vmem:[#allocation35_spill] sm:$0xff] }
 0x482   :  { %3790 = vmatprep.subr.bf16.mxu0 %v3789_v6  ;;  %3814 = vmatprep.subr.bf16.mxu1 %v3813_v15  ;;  %v3797_v7 = vpack.c.bf16 %v6102_v61, %v6101_v30  ;;  %v6127_v15 = vld [vmem:[#allocation36_spill] sm:$0xff]  ;;  %v6129_v61 = vld [vmem:[#allocation34_spill] sm:$0xff] }
 0x483   :  { %2528 = vmatprep.mubr.f32.mxu0 %v6051_v8  ;;  %3158 = vmatprep.mubr.f32.mxu1 %v6051_v8 }
 0x484   :  { %2534 = vmatmul.mubr.f32.gmra.mrb[10].mxu0 %v2533_v55  ;;  %3164 = vmatmul.mubr.f32.gmra.mrb[10].mxu1 %v3163_v50 }
 0x485   :  { %2634 = vmatprep.mubr.f32.mxu0 %v6051_v8  ;;  %3264 = vmatprep.mubr.f32.mxu1 %v6051_v8 }
 0x488   :  { %2636 = vmatmul.mubr.f32.vlgmr.msra.gmra.mrb[6].mxu0 %v5377_v28  ;;  %3266 = vmatmul.mubr.f32.vlgmr.msra.gmra.mrb[6].mxu1 %v5420_v11 }
 0x489   :  { %3792 = vmatpush1.bf16.msra.mxu0 %v3791_v56  ;;  %3816 = vmatpush1.bf16.msra.mxu1 %v3815_v16  ;;  %v6128_v56 = vld [vmem:[#allocation33_spill] sm:$0xff] }
 0x48a   :  { %2670 = vmatprep.subr.mxu0 %v5614_v20  ;;  %3300 = vmatprep.subr.mxu1 %v5620_v58  ;;  %v6117_v20 = vand.u32 4294901760, %v5656_v3  ;;  %v6120_v58 = vld [vmem:[#allocation19_spill] sm:$0xff] }
 0x48b   :  { %2641 = vmatprep.mubr.f32.mxu0 %v6051_v8  ;;  %3271 = vmatprep.mubr.f32.mxu1 %v6051_v8 }
 0x48c   :  { %2643 = vmatmul.mubr.f32.gmra.mrb[8].mxu0 %v5465_v54  ;;  %3273 = vmatmul.mubr.f32.gmra.mrb[8].mxu1 %v5521_v40 }
 0x48d   :  { %2673 = vmatpush1.msra.mxu0 %v5632_v25  ;;  %3303 = vmatpush1.msra.mxu1 %v5643_v27 }
 0x48e   :  { %3794 = vmatprep.subr.bf16.mxu0 %v5539_v2  ;;  %3818 = vmatprep.subr.bf16.mxu1 %v5551_v39 }
 0x48f   :  { %2648 = vmatprep.mubr.f32.mxu0 %v6051_v8  ;;  %3278 = vmatprep.mubr.f32.mxu1 %v6051_v8 }
 0x490   :  { %2650 = vmatmul.mubr.f32.gmra.mrb[10].mxu0 %v5599_v44  ;;  %3280 = vmatmul.mubr.f32.gmra.mrb[10].mxu1 %v5622_v38 }
 0x491   :  { %2732 = vmatprep.mubr.f32.mxu0 %v6051_v8  ;;  %3362 = vmatprep.mubr.f32.mxu1 %v6051_v8 }
 0x494   :  { %2735 = vmatmul.mubr.f32.vlgmr.msra.gmra.mrb[6].mxu0 %v5418_v5  ;;  %3365 = vmatmul.mubr.f32.vlgmr.msra.gmra.mrb[6].mxu1 %v5453_v48  ;;  %v6113_v5 = vand.u32 4294901760, %v5502_v1  ;;  %v6114_v48 = vand.u32 4294901760, %v5560_v62 }
 0x495   :  { %3796 = vmatpush1.bf16.msra.mxu0 %v5592_v51  ;;  %3820 = vmatpush1.bf16.msra.mxu1 %v5601_v0 }
 0x496   :  { %2766 = vmatprep.subr.mxu0 %v5575_v17  ;;  %3396 = vmatprep.subr.mxu1 %v5585_v41 }
 0x497   :  { %2740 = vmatprep.mubr.f32.mxu0 %v6051_v8  ;;  %3370 = vmatprep.mubr.f32.mxu1 %v6051_v8 }
 0x498   :  { %2743 = vmatmul.mubr.f32.gmra.mrb[8].mxu0 %v5502_v1  ;;  %3373 = vmatmul.mubr.f32.gmra.mrb[8].mxu1 %v5560_v62  ;;  %v6116_v1 = vand.u32 4294901760, %v5638_v60 }
 0x499   :  { %2768 = vmatpush1.msra.mxu0 %v5603_v32  ;;  %3398 = vmatpush1.msra.mxu1 %v5610_v37 }
 0x49a   :  { %3798 = vmatprep.subr.bf16.mxu0 %v3797_v7  ;;  %3822 = vmatprep.subr.bf16.mxu1 %v3821_v26 }
 0x49b   :  { %2748 = vmatprep.mubr.f32.mxu0 %v6051_v8  ;;  %3378 = vmatprep.mubr.f32.mxu1 %v6051_v8 }
 0x49c   :  { %2751 = vmatmul.mubr.f32.gmra.mrb[10].mxu0 %v5638_v60  ;;  %3381 = vmatmul.mubr.f32.gmra.mrb[10].mxu1 %v5656_v3  ;;  %v6125_v60 = vld [vmem:[#allocation26_spill] sm:$0xff] }
 0x49d   :  { %2827 = vmatprep.mubr.f32.mxu0 %v6051_v8  ;;  %3457 = vmatprep.mubr.f32.mxu1 %v6051_v8 }
 0x4a0   :  { %2831 = vmatmul.mubr.f32.vlgmr.msra.gmra.mrb[6].mxu0 %v6107_v52  ;;  %3461 = vmatmul.mubr.f32.vlgmr.msra.gmra.mrb[6].mxu1 %v6110_v23 }
 0x4a1   :  { %3800 = vmatpush1.bf16.msra.mxu0 %v3799_v46  ;;  %3824 = vmatpush1.bf16.msra.mxu1 %v3823_v43 }
 0x4a2   :  { %2874 = vmatprep.subr.mxu0 %v6111_v31  ;;  %3504 = vmatprep.subr.mxu1 %v6112_v57 }
 0x4a3   :  { %2836 = vmatprep.mubr.f32.mxu0 %v6051_v8  ;;  %3466 = vmatprep.mubr.f32.mxu1 %v6051_v8 }
 0x4a4   :  { %2840 = vmatmul.mubr.f32.gmra.mrb[8].mxu0 %v6113_v5  ;;  %3470 = vmatmul.mubr.f32.gmra.mrb[8].mxu1 %v6114_v48 }
 0x4a5   :  { %2878 = vmatpush1.msra.mxu0 %v2572_v22  ;;  %3508 = vmatpush1.msra.mxu1 %v6115_v19  ;;  %v6124_v22 = vld [vmem:[#allocation25_spill] sm:$0xff] }
 0x4a6   :  { %3802 = vmatprep.subr.bf16.mxu0 %v5539_v2  ;;  %3826 = vmatprep.subr.bf16.mxu1 %v5551_v39  ;;  %v6119_v39 = vld [vmem:[#allocation22_spill] sm:$0xff] }
 0x4a7   :  { %2845 = vmatprep.mubr.f32.mxu0 %v6051_v8  ;;  %3475 = vmatprep.mubr.f32.mxu1 %v6051_v8 }
 0x4a8   :  { %2849 = vmatmul.mubr.f32.gmra.mrb[10].mxu0 %v6116_v1  ;;  %3479 = vmatmul.mubr.f32.gmra.mrb[10].mxu1 %v6117_v20  ;;  %v6131_v1 = vld [vmem:[#allocation37_spill] sm:$0xff] }
 0x4a9   :  { %2937 = vmatprep.mubr.f32.mxu0 %v6051_v8  ;;  %3567 = vmatprep.mubr.f32.mxu1 %v6051_v8 }
 0x4ac   :  { %2939 = vmatmul.mubr.f32.vlgmr.msra.gmra.mrb[6].mxu0 %v5377_v28  ;;  %3569 = vmatmul.mubr.f32.vlgmr.msra.gmra.mrb[6].mxu1 %v5420_v11 }
 0x4ad   :  { %3804 = vmatpush1.bf16.msra.mxu0 %v5592_v51  ;;  %3828 = vmatpush1.bf16.msra.mxu1 %v5601_v0 }
 0x4ae   :  { %2968 = vmatprep.subr.mxu0 %v5575_v17  ;;  %3598 = vmatprep.subr.mxu1 %v5585_v41 }
 0x4af   :  { %2944 = vmatprep.mubr.f32.mxu0 %v6051_v8  ;;  %3574 = vmatprep.mubr.f32.mxu1 %v6051_v8 }
 0x4b0   :  { %2946 = vmatmul.mubr.f32.gmra.mrb[8].mxu0 %v5465_v54  ;;  %3576 = vmatmul.mubr.f32.gmra.mrb[8].mxu1 %v5521_v40 }
 0x4b1   :  { %2970 = vmatpush1.msra.mxu0 %v5603_v32  ;;  %3600 = vmatpush1.msra.mxu1 %v5610_v37 }
 0x4b2   :  { %2951 = vmatprep.mubr.f32.mxu0 %v6051_v8  ;;  %3581 = vmatprep.mubr.f32.mxu1 %v6051_v8 }
 0x4b4   :  { %2953 = vmatmul.mubr.f32.gmra.mrb[10].mxu0 %v5599_v44  ;;  %3583 = vmatmul.mubr.f32.gmra.mrb[10].mxu1 %v5622_v38 }
 0x4b5   :  { %3029 = vmatprep.mubr.f32.mxu0 %v6051_v8  ;;  %3659 = vmatprep.mubr.f32.mxu1 %v6051_v8 }
 0x4b8   :  { %3031 = vmatmul.mubr.f32.vlgmr.msra.gmra.mrb[6].mxu0 %v5377_v28  ;;  %3661 = vmatmul.mubr.f32.vlgmr.msra.gmra.mrb[6].mxu1 %v5420_v11  ;;  %v6118_v28 = vld [vmem:[#allocation21_spill] sm:$0xff] }
 0x4b9   :  { %3036 = vmatprep.mubr.f32.mxu0 %v6051_v8  ;;  %3666 = vmatprep.mubr.f32.mxu1 %v6051_v8 }
 0x4bc   :  { %3038 = vmatmul.mubr.f32.gmra.mrb[8].mxu0 %v5465_v54  ;;  %3668 = vmatmul.mubr.f32.gmra.mrb[8].mxu1 %v5521_v40  ;;  %v6121_v40 = vld [vmem:[#allocation20_spill] sm:$0xff] }
 0x4bd   :  { %3043 = vmatprep.mubr.f32.mxu0 %v6051_v8  ;;  %3673 = vmatprep.mubr.f32.mxu1 %v6051_v8 }
 0x4c0   :  { %3045 = vmatmul.mubr.f32.gmra.mrb[10].mxu0 %v5599_v44  ;;  %3675 = vmatmul.mubr.f32.gmra.mrb[10].mxu1 %v5622_v38  ;;  %v6123_v44 = vld [vmem:[#allocation28_spill] sm:$0xff] }
 0x543   :  { %v1772_v32 = vpop.f32.mrb[0].mxu0  ;;  %v2402_v11 = vpop.f32.mrb[0].mxu1 }
 0x544   :  { %v3681_v0 = vadd.f32 %v1772_v32, %v6118_v28  ;;  %v1774_v2 = vpop.f32.mrb[1].mxu0  ;;  %v3687_v62 = vadd.f32 %v2402_v11, %v6119_v39  ;;  %v2404_v54 = vpop.f32.mrb[1].mxu1 }
 0x545   :  { %v3682_v17 = vadd.f32 %v1774_v2, %v6120_v58  ;;  %v3688_v8 = vadd.f32 %v2404_v54, %v6121_v40 }
 0x546   :  { %3705 = vst [vmem:[%s5921_s5] sm:$0xff] %v3681_v0  ;;  %3711 = vst [vmem:[%s5921_s5 + $0x30] sm:$0xff] %v3687_v62 }
 0x547   :  { %3706 = vst [vmem:[%s5921_s5 + $0x8] sm:$0xff] %v3682_v17  ;;  %v1779_v38 = vpop.f32.mrb[2].mxu0  ;;  %3712 = vst [vmem:[%s5921_s5 + $0x38] sm:$0xff] %v3688_v8  ;;  %v2409_v51 = vpop.f32.mrb[2].mxu1 }
 0x548   :  { %v3683_v41 = vadd.f32 %v1779_v38, %v6122_v42  ;;  %v1781_v18 = vpop.f32.mrb[3].mxu0  ;;  %v3689_v37 = vadd.f32 %v2409_v51, %v6123_v44  ;;  %v2411_v25 = vpop.f32.mrb[3].mxu1 }
 0x549   :  { %v3684_v27 = vadd.f32 %v1781_v18, %v6124_v22  ;;  %v3690_v3 = vadd.f32 %v2411_v25, %v6125_v60 }
 0x54a   :  { %3707 = vst [vmem:[%s5921_s5 + $0x10] sm:$0xff] %v3683_v41  ;;  %3713 = vst [vmem:[%s5921_s5 + $0x40] sm:$0xff] %v3689_v37 }
 0x54b   :  { %3708 = vst [vmem:[%s5921_s5 + $0x18] sm:$0xff] %v3684_v27  ;;  %v1786_v13 = vpop.f32.mrb[4].mxu0  ;;  %3714 = vst [vmem:[%s5921_s5 + $0x48] sm:$0xff] %v3690_v3  ;;  %v2416_v6 = vpop.f32.mrb[4].mxu1 }
 0x54c   :  { %v3685_v47 = vadd.f32 %v1786_v13, %v6126_v14  ;;  %v1788_v55 = vpop.f32.mrb[5].mxu0  ;;  %v3691_v50 = vadd.f32 %v2416_v6, %v6127_v15  ;;  %v2418_v30 = vpop.f32.mrb[5].mxu1 }
 0x54d   :  { %v3686_v16 = vadd.f32 %v1788_v55, %v6128_v56  ;;  %v3692_v7 = vadd.f32 %v2418_v30, %v6129_v61 }
 0x54e   :  { %3709 = vst [vmem:[%s5921_s5 + $0x20] sm:$0x1] %v3685_v47  ;;  %3715 = vst [vmem:[%s5921_s5 + $0x50] sm:$0x1] %v3691_v50 }
 0x54f   :  { %3710 = vst [vmem:[%s5921_s5 + $0x28] sm:$0x1] %v3686_v16  ;;  %3716 = vst [vmem:[%s5921_s5 + $0x58] sm:$0x1] %v3692_v7 }
 0x58b   :  { %v3032_v49 = vpop.f32.mrb[6].mxu0  ;;  %v3662_v26 = vpop.f32.mrb[6].mxu1 }
 0x58c   :  { %v3693_v36 = vadd.f32 %v3032_v49, %v5460_v53  ;;  %v3034_v21 = vpop.f32.mrb[7].mxu0  ;;  %v3699_v29 = vadd.f32 %v3662_v26, %v5469_v9  ;;  %v3664_v52 = vpop.f32.mrb[7].mxu1 }
 0x58d   :  { %v3694_v46 = vadd.f32 %v3034_v21, %v5395_v33  ;;  %v3700_v35 = vadd.f32 %v3664_v52, %v5403_v10 }
 0x58e   :  { %3717 = vst [vmem:[%s5921_s5 + $0x60] sm:$0xff] %v3693_v36  ;;  %3723 = vst [vmem:[%s5921_s5 + $0x90] sm:$0xff] %v3699_v29 }
 0x58f   :  { %3718 = vst [vmem:[%s5921_s5 + $0x68] sm:$0xff] %v3694_v46  ;;  %v3039_v53 = vpop.f32.mrb[8].mxu0  ;;  %3724 = vst [vmem:[%s5921_s5 + $0x98] sm:$0xff] %v3700_v35  ;;  %v3669_v9 = vpop.f32.mrb[8].mxu1 }
 0x590   :  { %v3695_v33 = vadd.f32 %v3039_v53, %v5477_v4  ;;  %v3041_v45 = vpop.f32.mrb[9].mxu0  ;;  %v3701_v43 = vadd.f32 %v3669_v9, %v5482_v63  ;;  %v3671_v23 = vpop.f32.mrb[9].mxu1 }
 0x591   :  { %v3696_v10 = vadd.f32 %v3041_v45, %v5415_v12  ;;  %v3702_v31 = vadd.f32 %v3671_v23, %v5431_v59  ;;  %v6130_v59 = vld [vmem:[#allocation38_spill] sm:$0xff] }
 0x592   :  { %3719 = vst [vmem:[%s5921_s5 + $0x70] sm:$0xff] %v3695_v33  ;;  %3725 = vst [vmem:[%s5921_s5 + $0xa0] sm:$0xff] %v3701_v43 }
 0x593   :  { %3720 = vst [vmem:[%s5921_s5 + $0x78] sm:$0xff] %v3696_v10  ;;  %v3046_v4 = vpop.f32.mrb[10].mxu0  ;;  %3726 = vst [vmem:[%s5921_s5 + $0xa8] sm:$0xff] %v3702_v31  ;;  %v3676_v63 = vpop.f32.mrb[10].mxu1 }
 0x594   :  { %v3697_v12 = vadd.f32 %v3046_v4, %v5252_v24  ;;  %v3048_v57 = vpop.f32.mrb[11].mxu0  ;;  %v3703_v5 = vadd.f32 %v3676_v63, %v5196_v34  ;;  %v3678_v19 = vpop.f32.mrb[11].mxu1 }
 0x595   :  { %v3698_v48 = vadd.f32 %v3048_v57, %v6130_v59  ;;  %v3704_v20 = vadd.f32 %v3678_v19, %v6131_v1 }
 0x596   :  { %3721 = vst [vmem:[%s5921_s5 + $0x80] sm:$0x1] %v3697_v12  ;;  %3727 = vst [vmem:[%s5921_s5 + $0xb0] sm:$0x1] %v3703_v5 }
 0x597   :  { %3722 = vst [vmem:[%s5921_s5 + $0x88] sm:$0x1] %v3698_v48  ;;  %3728 = vst [vmem:[%s5921_s5 + $0xb8] sm:$0x1] %v3704_v20 }

</bundles_post_ra>
